<compile_context>
chip_gen: v7x
topology: tpu7x:2x2x1
jax: 0.10.0
libtpu: 0.0.40
codegen_flags: <defaults>
</compile_context>

<pallas_src>
import jax
import jax.numpy as jnp
from jax.experimental import pallas as pl
from jax.experimental.pallas import tpu as pltpu

# ----------------------------- configuration -------------------------------
LATENT_DIM = 32
NUM_CLASSES = 10
IMG_SHAPE = (1, 16, 16)          # (C, H, W)
IMG_FLAT = 1 * 16 * 16           # int(np.prod(img_shape))
BATCH = 8
HIDDEN = (256, 512, 1024)
BN_EPS = 1e-5
LEAKY_SLOPE = 0.2


# ------------------------------- kernel ------------------------------------
def _generator_kernel(
    labels_ref,                       # (B, 1)  int32
    z_ref,                            # (B, LATENT_DIM) f32
    emb_ref,                          # (NUM_CLASSES, LATENT_DIM) f32
    w1z_ref, w1e_ref,                 # (LATENT_DIM, 256) bf16 each (split W1)
    g1_ref, be1_ref,                  # BN1 affine
    w2_ref, g2_ref, be2_ref,          # layer 2
    w3_hbm_ref,                       # (512, 1024) bf16, memory_space=ANY (HBM)
    g3_ref, be3_ref,                  # BN3 affine
    w4_hbm_ref,                       # (1024, IMG_FLAT) bf16, memory_space=ANY
    b4_ref,                           # (1, IMG_FLAT) f32
    o_ref,                            # (B, IMG_FLAT) f32
    w3_buf, w4_buf, dma_sem,          # scratch: VMEM bufs + DMA semaphores
):
    # Kick off the big-weight DMAs immediately so they overlap layers 1-2.
    cp3 = pltpu.make_async_copy(w3_hbm_ref, w3_buf, dma_sem.at[0])
    cp3.start()
    cp4 = pltpu.make_async_copy(w4_hbm_ref, w4_buf, dma_sem.at[1])
    cp4.start()

    def bn_lrelu(y, g_r, be_r):
        # Training-mode BatchNorm1d (biased batch variance, eps=1e-5),
        # gamma folded into the normalization scale.
        mean = jnp.mean(y, axis=0, keepdims=True)
        var = jnp.mean(jnp.square(y - mean), axis=0, keepdims=True)
        scale = g_r[...] * jax.lax.rsqrt(var + BN_EPS)
        y_hat = (y - mean) * scale + be_r[...]
        # LeakyReLU(0.2)  (slope < 1  =>  max(y, 0.2*y) is exact)
        return jnp.maximum(y_hat, LEAKY_SLOPE * y_hat)

    # Fused embedding gather: one-hot(labels) @ emb_table.
    lab = labels_ref[...]                                         # (B, 1) int32
    iota = jax.lax.broadcasted_iota(jnp.int32, (lab.shape[0], NUM_CLASSES), 1)
    onehot = (lab == iota).astype(jnp.float32)                    # (B, NUM_CLASSES)
    e = jnp.dot(onehot, emb_ref[...],
                preferred_element_type=jnp.float32)               # (B, LATENT_DIM)

    # Layer 1: cat([z, e], 1) @ W1  ==  z @ W1[:L] + e @ W1[L:]
    # (the Linear bias is cancelled by the BN mean subtraction -> dropped).
    z = z_ref[...]
    y1 = (jnp.dot(z, w1z_ref[...].astype(jnp.float32),
                  preferred_element_type=jnp.float32)
          + jnp.dot(e, w1e_ref[...].astype(jnp.float32),
                    preferred_element_type=jnp.float32))
    h1 = bn_lrelu(y1, g1_ref, be1_ref)

    # Layer 2
    y2 = jnp.dot(h1, w2_ref[...].astype(jnp.float32),
                 preferred_element_type=jnp.float32)
    h2 = bn_lrelu(y2, g2_ref, be2_ref)

    # Layer 3 (weight arrives via the overlapped manual DMA)
    cp3.wait()
    y3 = jnp.dot(h2, w3_buf[...].astype(jnp.float32),
                 preferred_element_type=jnp.float32)
    h3 = bn_lrelu(y3, g3_ref, be3_ref)

    # Final Linear + Tanh
    cp4.wait()
    y4 = jnp.dot(h3, w4_buf[...].astype(jnp.float32),
                 preferred_element_type=jnp.float32) + b4_ref[...]
    o_ref[...] = jnp.tanh(y4)


# ------------------------------ wrapper -------------------------------------
def init_params(key):
    """Deterministic parameter init (shapes match the PyTorch module).

    Weights are stored in bf16 (bandwidth), everything else in f32.
    Pre-BN Linear biases b1..b3 are not materialized: training-mode BatchNorm
    cancels them exactly, so the forward pass is mathematically identical.
    """
    dims = [(2 * LATENT_DIM, HIDDEN[0]),
            (HIDDEN[0], HIDDEN[1]),
            (HIDDEN[1], HIDDEN[2]),
            (HIDDEN[2], IMG_FLAT)]
    keys = jax.random.split(key, 1 + 2 * len(dims))
    params = {}
    params["emb"] = jax.random.normal(keys[0], (NUM_CLASSES, LATENT_DIM),
                                      jnp.float32)
    k_idx = 1
    for li, (fin, fout) in enumerate(dims, start=1):
        scale = 1.0 / (float(fin) ** 0.5)
        w = jax.random.uniform(keys[k_idx], (fin, fout), jnp.float32,
                               -scale, scale)
        if li == 1:
            # Pre-split W1 so the kernel never has to concatenate [z, emb].
            params["w1z"] = w[:LATENT_DIM].astype(jnp.bfloat16)
            params["w1e"] = w[LATENT_DIM:].astype(jnp.bfloat16)
        else:
            params[f"w{li}"] = w.astype(jnp.bfloat16)
        if li == len(dims):
            params[f"b{li}"] = jax.random.uniform(
                keys[k_idx + 1], (1, fout), jnp.float32, -scale, scale)
        k_idx += 2
        if li <= 3:
            # BatchNorm affine params (PyTorch default: gamma=1, beta=0)
            params[f"g{li}"] = jnp.ones((1, fout), jnp.float32)
            params[f"be{li}"] = jnp.zeros((1, fout), jnp.float32)
    return params


def _cost_estimate(batch):
    h0, h1, h2 = HIDDEN
    flops = 2 * batch * (NUM_CLASSES * LATENT_DIM          # one-hot gather matmul
                         + 2 * LATENT_DIM * h0
                         + h0 * h1 + h1 * h2 + h2 * IMG_FLAT)
    transcendentals = batch * IMG_FLAT + (h0 + h1 + h2)    # tanh + rsqrt
    weight_bytes = 2 * (2 * LATENT_DIM * h0 + h0 * h1 + h1 * h2 + h2 * IMG_FLAT)
    f32_bytes = 4 * (batch * LATENT_DIM + NUM_CLASSES * LATENT_DIM
                     + 2 * (h0 + h1 + h2) + IMG_FLAT
                     + batch * IMG_FLAT + batch)
    return pl.CostEstimate(flops=int(flops),
                           transcendentals=int(transcendentals),
                           bytes_accessed=int(weight_bytes + f32_bytes))


@jax.jit
def generator_forward(params, z, labels):
    batch = z.shape[0]
    labels2d = labels.reshape(batch, 1).astype(jnp.int32)

    operands = (
        labels2d, z, params["emb"],
        params["w1z"], params["w1e"], params["g1"], params["be1"],
        params["w2"], params["g2"], params["be2"],
        params["w3"], params["g3"], params["be3"],
        params["w4"], params["b4"],
    )
    vmem = pl.BlockSpec(memory_space=pltpu.VMEM)
    hbm = pl.BlockSpec(memory_space=pl.ANY)       # manual DMA inside the kernel
    in_specs = [
        vmem,              # labels
        vmem,              # z
        vmem,              # emb
        vmem, vmem,        # w1z, w1e
        vmem, vmem,        # g1, be1
        vmem, vmem, vmem,  # w2, g2, be2
        hbm,               # w3  (overlapped copy)
        vmem, vmem,        # g3, be3
        hbm,               # w4  (overlapped copy)
        vmem,              # b4
    ]

    img_flat = pl.pallas_call(
        _generator_kernel,
        out_shape=jax.ShapeDtypeStruct((batch, IMG_FLAT), jnp.float32),
        in_specs=in_specs,
        out_specs=pl.BlockSpec(memory_space=pltpu.VMEM),
        scratch_shapes=[
            pltpu.VMEM((HIDDEN[1], HIDDEN[2]), jnp.bfloat16),   # w3 buffer
            pltpu.VMEM((HIDDEN[2], IMG_FLAT), jnp.bfloat16),    # w4 buffer
            pltpu.SemaphoreType.DMA((2,)),
        ],
        compiler_params=pltpu.CompilerParams(vmem_limit_bytes=12 << 20),
        cost_estimate=_cost_estimate(batch),
    )(*operands)

    # img.view(img.size(0), *self.img_shape)  ->  NCHW
    return img_flat.reshape(batch, *IMG_SHAPE)


# --------------------------------- main --------------------------------------
if __name__ == "__main__":
    key = jax.random.PRNGKey(0)
    k_param, k_z, k_lab = jax.random.split(key, 3)

    params = init_params(k_param)
    z = jax.random.normal(k_z, (BATCH, LATENT_DIM), jnp.float32)
    labels = jax.random.randint(k_lab, (BATCH,), 0, NUM_CLASSES, jnp.int32)

    img = generator_forward(params, z, labels)
    jax.block_until_ready(img)

    assert img.shape == (BATCH, *IMG_SHAPE), img.shape
    assert img.dtype == jnp.float32
    assert bool(jnp.all(jnp.isfinite(img)))
    print("KERNEL_OK")
</pallas_src>

<mosaic_0001>
module attributes {stable_mosaic.version = 11 : i64} {
  func.func @_generator_kernel(%arg0: memref<8x1xi32, #tpu.memory_space<vmem>>, %arg1: memref<8x32xf32, #tpu.memory_space<vmem>>, %arg2: memref<10x32xf32, #tpu.memory_space<vmem>>, %arg3: memref<32x256xbf16, #tpu.memory_space<vmem>>, %arg4: memref<32x256xbf16, #tpu.memory_space<vmem>>, %arg5: memref<1x256xf32, #tpu.memory_space<vmem>>, %arg6: memref<1x256xf32, #tpu.memory_space<vmem>>, %arg7: memref<256x512xbf16, #tpu.memory_space<vmem>>, %arg8: memref<1x512xf32, #tpu.memory_space<vmem>>, %arg9: memref<1x512xf32, #tpu.memory_space<vmem>>, %arg10: memref<512x1024xbf16, #tpu.memory_space<any>>, %arg11: memref<1x1024xf32, #tpu.memory_space<vmem>>, %arg12: memref<1x1024xf32, #tpu.memory_space<vmem>>, %arg13: memref<1024x256xbf16, #tpu.memory_space<any>>, %arg14: memref<1x256xf32, #tpu.memory_space<vmem>>, %arg15: memref<8x256xf32, #tpu.memory_space<vmem>>, %arg16: memref<512x1024xbf16, #tpu.memory_space<vmem>>, %arg17: memref<1024x256xbf16, #tpu.memory_space<vmem>>, %arg18: memref<2x!tpu.dma_semaphore, #tpu.memory_space<semaphore_mem>>) attributes {dimension_semantics = [], scalar_prefetch = 0 : i64, scratch_operands = 3 : i64, tpu.core_type = #tpu.core_type<tc>} {
    %c0_i32 = arith.constant 0 : i32
    %0 = tpu.memref_slice %arg18[%c0_i32] : memref<2x!tpu.dma_semaphore, #tpu.memory_space<semaphore_mem>> -> memref<1x!tpu.dma_semaphore, #tpu.memory_space<semaphore_mem>>
    %1 = tpu.memref_squeeze %0 : memref<1x!tpu.dma_semaphore, #tpu.memory_space<semaphore_mem>> -> memref<!tpu.dma_semaphore, #tpu.memory_space<semaphore_mem>>
    tpu.enqueue_dma source(%arg10 : memref<512x1024xbf16, #tpu.memory_space<any>>) target(%arg16 : memref<512x1024xbf16, #tpu.memory_space<vmem>>) target_semaphore(%1 : memref<!tpu.dma_semaphore, #tpu.memory_space<semaphore_mem>>)
    %c1_i32 = arith.constant 1 : i32
    %2 = tpu.memref_slice %arg18[%c1_i32] : memref<2x!tpu.dma_semaphore, #tpu.memory_space<semaphore_mem>> -> memref<1x!tpu.dma_semaphore, #tpu.memory_space<semaphore_mem>>
    %3 = tpu.memref_squeeze %2 : memref<1x!tpu.dma_semaphore, #tpu.memory_space<semaphore_mem>> -> memref<!tpu.dma_semaphore, #tpu.memory_space<semaphore_mem>>
    tpu.enqueue_dma source(%arg13 : memref<1024x256xbf16, #tpu.memory_space<any>>) target(%arg17 : memref<1024x256xbf16, #tpu.memory_space<vmem>>) target_semaphore(%3 : memref<!tpu.dma_semaphore, #tpu.memory_space<semaphore_mem>>)
    %c0 = arith.constant 0 : index
    %c0_0 = arith.constant 0 : index
    %4 = vector.load %arg0[%c0, %c0_0] : memref<8x1xi32, #tpu.memory_space<vmem>>, vector<8x1xi32>
    %5 = tpu.iota {dimensions = array<i32: 1>} : vector<8x10xi32>
    %6 = vector.broadcast %4 : vector<8x1xi32> to vector<8x10xi32>
    %7 = arith.cmpi eq, %6, %5 : vector<8x10xi32>
    %8 = arith.extui %7 : vector<8x10xi1> to vector<8x10xi32>
    %9 = arith.sitofp %8 : vector<8x10xi32> to vector<8x10xf32>
    %c0_1 = arith.constant 0 : index
    %c0_2 = arith.constant 0 : index
    %10 = vector.load %arg2[%c0_1, %c0_2] : memref<10x32xf32, #tpu.memory_space<vmem>>, vector<10x32xf32>
    %cst = arith.constant dense<0.000000e+00> : vector<8x32xf32>
    %11 = tpu.matmul %9, %10, %cst {dimension_numbers = #tpu.dot_dimension_numbers<[1], [0], [0], [1], [0, 0, 1, 1], [], []>} : vector<8x10xf32>, vector<10x32xf32>, vector<8x32xf32> -> vector<8x32xf32>
    %c0_3 = arith.constant 0 : index
    %c0_4 = arith.constant 0 : index
    %12 = vector.load %arg1[%c0_3, %c0_4] : memref<8x32xf32, #tpu.memory_space<vmem>>, vector<8x32xf32>
    %c0_5 = arith.constant 0 : index
    %c0_6 = arith.constant 0 : index
    %13 = vector.load %arg3[%c0_5, %c0_6] : memref<32x256xbf16, #tpu.memory_space<vmem>>, vector<32x256xbf16>
    %14 = arith.extf %13 : vector<32x256xbf16> to vector<32x256xf32>
    %cst_7 = arith.constant dense<0.000000e+00> : vector<8x256xf32>
    %15 = tpu.matmul %12, %14, %cst_7 {dimension_numbers = #tpu.dot_dimension_numbers<[1], [0], [0], [1], [0, 0, 1, 1], [], []>} : vector<8x32xf32>, vector<32x256xf32>, vector<8x256xf32> -> vector<8x256xf32>
    %c0_8 = arith.constant 0 : index
    %c0_9 = arith.constant 0 : index
    %16 = vector.load %arg4[%c0_8, %c0_9] : memref<32x256xbf16, #tpu.memory_space<vmem>>, vector<32x256xbf16>
    %17 = arith.extf %16 : vector<32x256xbf16> to vector<32x256xf32>
    %cst_10 = arith.constant dense<0.000000e+00> : vector<8x256xf32>
    %18 = tpu.matmul %11, %17, %cst_10 {dimension_numbers = #tpu.dot_dimension_numbers<[1], [0], [0], [1], [0, 0, 1, 1], [], []>} : vector<8x32xf32>, vector<32x256xf32>, vector<8x256xf32> -> vector<8x256xf32>
    %19 = arith.addf %15, %18 : vector<8x256xf32>
    %cst_11 = arith.constant dense<0.000000e+00> : vector<256xf32>
    %20 = vector.multi_reduction <add>, %19, %cst_11 [0] : vector<8x256xf32> to vector<256xf32>
    %21 = vector.shape_cast %20 : vector<256xf32> to vector<1x256xf32>
    %cst_12 = arith.constant 8.000000e+00 : f32
    %22 = vector.broadcast %cst_12 : f32 to vector<1x256xf32>
    %23 = arith.divf %21, %22 : vector<1x256xf32>
    %24 = vector.broadcast %23 : vector<1x256xf32> to vector<8x256xf32>
    %25 = arith.subf %19, %24 : vector<8x256xf32>
    %26 = arith.mulf %25, %25 : vector<8x256xf32>
    %cst_13 = arith.constant dense<0.000000e+00> : vector<256xf32>
    %27 = vector.multi_reduction <add>, %26, %cst_13 [0] : vector<8x256xf32> to vector<256xf32>
    %28 = vector.shape_cast %27 : vector<256xf32> to vector<1x256xf32>
    %cst_14 = arith.constant 8.000000e+00 : f32
    %29 = vector.broadcast %cst_14 : f32 to vector<1x256xf32>
    %30 = arith.divf %28, %29 : vector<1x256xf32>
    %c0_15 = arith.constant 0 : index
    %c0_16 = arith.constant 0 : index
    %31 = vector.load %arg5[%c0_15, %c0_16] : memref<1x256xf32, #tpu.memory_space<vmem>>, vector<1x256xf32>
    %cst_17 = arith.constant 9.99999974E-6 : f32
    %32 = vector.broadcast %cst_17 : f32 to vector<1x256xf32>
    %33 = arith.addf %30, %32 : vector<1x256xf32>
    %34 = math.rsqrt %33 : vector<1x256xf32>
    %35 = arith.mulf %31, %34 : vector<1x256xf32>
    %36 = vector.broadcast %23 : vector<1x256xf32> to vector<8x256xf32>
    %37 = arith.subf %19, %36 : vector<8x256xf32>
    %38 = vector.broadcast %35 : vector<1x256xf32> to vector<8x256xf32>
    %39 = arith.mulf %37, %38 : vector<8x256xf32>
    %c0_18 = arith.constant 0 : index
    %c0_19 = arith.constant 0 : index
    %40 = vector.load %arg6[%c0_18, %c0_19] : memref<1x256xf32, #tpu.memory_space<vmem>>, vector<1x256xf32>
    %41 = vector.broadcast %40 : vector<1x256xf32> to vector<8x256xf32>
    %42 = arith.addf %39, %41 : vector<8x256xf32>
    %cst_20 = arith.constant 2.000000e-01 : f32
    %43 = vector.broadcast %cst_20 : f32 to vector<8x256xf32>
    %44 = arith.mulf %43, %42 : vector<8x256xf32>
    %45 = arith.maximumf %42, %44 : vector<8x256xf32>
    %c0_21 = arith.constant 0 : index
    %c0_22 = arith.constant 0 : index
    %46 = vector.load %arg7[%c0_21, %c0_22] : memref<256x512xbf16, #tpu.memory_space<vmem>>, vector<256x512xbf16>
    %47 = arith.extf %46 : vector<256x512xbf16> to vector<256x512xf32>
    %cst_23 = arith.constant dense<0.000000e+00> : vector<8x512xf32>
    %48 = tpu.matmul %45, %47, %cst_23 {dimension_numbers = #tpu.dot_dimension_numbers<[1], [0], [0], [1], [0, 0, 1, 1], [], []>} : vector<8x256xf32>, vector<256x512xf32>, vector<8x512xf32> -> vector<8x512xf32>
    %cst_24 = arith.constant dense<0.000000e+00> : vector<512xf32>
    %49 = vector.multi_reduction <add>, %48, %cst_24 [0] : vector<8x512xf32> to vector<512xf32>
    %50 = vector.shape_cast %49 : vector<512xf32> to vector<1x512xf32>
    %cst_25 = arith.constant 8.000000e+00 : f32
    %51 = vector.broadcast %cst_25 : f32 to vector<1x512xf32>
    %52 = arith.divf %50, %51 : vector<1x512xf32>
    %53 = vector.broadcast %52 : vector<1x512xf32> to vector<8x512xf32>
    %54 = arith.subf %48, %53 : vector<8x512xf32>
    %55 = arith.mulf %54, %54 : vector<8x512xf32>
    %cst_26 = arith.constant dense<0.000000e+00> : vector<512xf32>
    %56 = vector.multi_reduction <add>, %55, %cst_26 [0] : vector<8x512xf32> to vector<512xf32>
    %57 = vector.shape_cast %56 : vector<512xf32> to vector<1x512xf32>
    %cst_27 = arith.constant 8.000000e+00 : f32
    %58 = vector.broadcast %cst_27 : f32 to vector<1x512xf32>
    %59 = arith.divf %57, %58 : vector<1x512xf32>
    %c0_28 = arith.constant 0 : index
    %c0_29 = arith.constant 0 : index
    %60 = vector.load %arg8[%c0_28, %c0_29] : memref<1x512xf32, #tpu.memory_space<vmem>>, vector<1x512xf32>
    %cst_30 = arith.constant 9.99999974E-6 : f32
    %61 = vector.broadcast %cst_30 : f32 to vector<1x512xf32>
    %62 = arith.addf %59, %61 : vector<1x512xf32>
    %63 = math.rsqrt %62 : vector<1x512xf32>
    %64 = arith.mulf %60, %63 : vector<1x512xf32>
    %65 = vector.broadcast %52 : vector<1x512xf32> to vector<8x512xf32>
    %66 = arith.subf %48, %65 : vector<8x512xf32>
    %67 = vector.broadcast %64 : vector<1x512xf32> to vector<8x512xf32>
    %68 = arith.mulf %66, %67 : vector<8x512xf32>
    %c0_31 = arith.constant 0 : index
    %c0_32 = arith.constant 0 : index
    %69 = vector.load %arg9[%c0_31, %c0_32] : memref<1x512xf32, #tpu.memory_space<vmem>>, vector<1x512xf32>
    %70 = vector.broadcast %69 : vector<1x512xf32> to vector<8x512xf32>
    %71 = arith.addf %68, %70 : vector<8x512xf32>
    %cst_33 = arith.constant 2.000000e-01 : f32
    %72 = vector.broadcast %cst_33 : f32 to vector<8x512xf32>
    %73 = arith.mulf %72, %71 : vector<8x512xf32>
    %74 = arith.maximumf %71, %73 : vector<8x512xf32>
    %c0_i32_34 = arith.constant 0 : i32
    %75 = tpu.memref_slice %arg18[%c0_i32_34] : memref<2x!tpu.dma_semaphore, #tpu.memory_space<semaphore_mem>> -> memref<1x!tpu.dma_semaphore, #tpu.memory_space<semaphore_mem>>
    %76 = tpu.memref_squeeze %75 : memref<1x!tpu.dma_semaphore, #tpu.memory_space<semaphore_mem>> -> memref<!tpu.dma_semaphore, #tpu.memory_space<semaphore_mem>>
    tpu.wait_dma2 semaphore(%76 : memref<!tpu.dma_semaphore, #tpu.memory_space<semaphore_mem>>) src(%arg10 : memref<512x1024xbf16, #tpu.memory_space<any>>) dst(%arg16 : memref<512x1024xbf16, #tpu.memory_space<vmem>>)
    %c0_35 = arith.constant 0 : index
    %c0_36 = arith.constant 0 : index
    %77 = vector.load %arg16[%c0_35, %c0_36] : memref<512x1024xbf16, #tpu.memory_space<vmem>>, vector<512x1024xbf16>
    %78 = arith.extf %77 : vector<512x1024xbf16> to vector<512x1024xf32>
    %cst_37 = arith.constant dense<0.000000e+00> : vector<8x1024xf32>
    %79 = tpu.matmul %74, %78, %cst_37 {dimension_numbers = #tpu.dot_dimension_numbers<[1], [0], [0], [1], [0, 0, 1, 1], [], []>} : vector<8x512xf32>, vector<512x1024xf32>, vector<8x1024xf32> -> vector<8x1024xf32>
    %cst_38 = arith.constant dense<0.000000e+00> : vector<1024xf32>
    %80 = vector.multi_reduction <add>, %79, %cst_38 [0] : vector<8x1024xf32> to vector<1024xf32>
    %81 = vector.shape_cast %80 : vector<1024xf32> to vector<1x1024xf32>
    %cst_39 = arith.constant 8.000000e+00 : f32
    %82 = vector.broadcast %cst_39 : f32 to vector<1x1024xf32>
    %83 = arith.divf %81, %82 : vector<1x1024xf32>
    %84 = vector.broadcast %83 : vector<1x1024xf32> to vector<8x1024xf32>
    %85 = arith.subf %79, %84 : vector<8x1024xf32>
    %86 = arith.mulf %85, %85 : vector<8x1024xf32>
    %cst_40 = arith.constant dense<0.000000e+00> : vector<1024xf32>
    %87 = vector.multi_reduction <add>, %86, %cst_40 [0] : vector<8x1024xf32> to vector<1024xf32>
    %88 = vector.shape_cast %87 : vector<1024xf32> to vector<1x1024xf32>
    %cst_41 = arith.constant 8.000000e+00 : f32
    %89 = vector.broadcast %cst_41 : f32 to vector<1x1024xf32>
    %90 = arith.divf %88, %89 : vector<1x1024xf32>
    %c0_42 = arith.constant 0 : index
    %c0_43 = arith.constant 0 : index
    %91 = vector.load %arg11[%c0_42, %c0_43] : memref<1x1024xf32, #tpu.memory_space<vmem>>, vector<1x1024xf32>
    %cst_44 = arith.constant 9.99999974E-6 : f32
    %92 = vector.broadcast %cst_44 : f32 to vector<1x1024xf32>
    %93 = arith.addf %90, %92 : vector<1x1024xf32>
    %94 = math.rsqrt %93 : vector<1x1024xf32>
    %95 = arith.mulf %91, %94 : vector<1x1024xf32>
    %96 = vector.broadcast %83 : vector<1x1024xf32> to vector<8x1024xf32>
    %97 = arith.subf %79, %96 : vector<8x1024xf32>
    %98 = vector.broadcast %95 : vector<1x1024xf32> to vector<8x1024xf32>
    %99 = arith.mulf %97, %98 : vector<8x1024xf32>
    %c0_45 = arith.constant 0 : index
    %c0_46 = arith.constant 0 : index
    %100 = vector.load %arg12[%c0_45, %c0_46] : memref<1x1024xf32, #tpu.memory_space<vmem>>, vector<1x1024xf32>
    %101 = vector.broadcast %100 : vector<1x1024xf32> to vector<8x1024xf32>
    %102 = arith.addf %99, %101 : vector<8x1024xf32>
    %cst_47 = arith.constant 2.000000e-01 : f32
    %103 = vector.broadcast %cst_47 : f32 to vector<8x1024xf32>
    %104 = arith.mulf %103, %102 : vector<8x1024xf32>
    %105 = arith.maximumf %102, %104 : vector<8x1024xf32>
    %c1_i32_48 = arith.constant 1 : i32
    %106 = tpu.memref_slice %arg18[%c1_i32_48] : memref<2x!tpu.dma_semaphore, #tpu.memory_space<semaphore_mem>> -> memref<1x!tpu.dma_semaphore, #tpu.memory_space<semaphore_mem>>
    %107 = tpu.memref_squeeze %106 : memref<1x!tpu.dma_semaphore, #tpu.memory_space<semaphore_mem>> -> memref<!tpu.dma_semaphore, #tpu.memory_space<semaphore_mem>>
    tpu.wait_dma2 semaphore(%107 : memref<!tpu.dma_semaphore, #tpu.memory_space<semaphore_mem>>) src(%arg13 : memref<1024x256xbf16, #tpu.memory_space<any>>) dst(%arg17 : memref<1024x256xbf16, #tpu.memory_space<vmem>>)
    %c0_49 = arith.constant 0 : index
    %c0_50 = arith.constant 0 : index
    %108 = vector.load %arg17[%c0_49, %c0_50] : memref<1024x256xbf16, #tpu.memory_space<vmem>>, vector<1024x256xbf16>
    %109 = arith.extf %108 : vector<1024x256xbf16> to vector<1024x256xf32>
    %cst_51 = arith.constant dense<0.000000e+00> : vector<8x256xf32>
    %110 = tpu.matmul %105, %109, %cst_51 {dimension_numbers = #tpu.dot_dimension_numbers<[1], [0], [0], [1], [0, 0, 1, 1], [], []>} : vector<8x1024xf32>, vector<1024x256xf32>, vector<8x256xf32> -> vector<8x256xf32>
    %c0_52 = arith.constant 0 : index
    %c0_53 = arith.constant 0 : index
    %111 = vector.load %arg14[%c0_52, %c0_53] : memref<1x256xf32, #tpu.memory_space<vmem>>, vector<1x256xf32>
    %112 = vector.broadcast %111 : vector<1x256xf32> to vector<8x256xf32>
    %113 = arith.addf %110, %112 : vector<8x256xf32>
    %114 = math.tanh %113 : vector<8x256xf32>
    %c0_54 = arith.constant 0 : index
    %c0_55 = arith.constant 0 : index
    %115 = vector.load %arg15[%c0_54, %c0_55] : memref<8x256xf32, #tpu.memory_space<vmem>>, vector<8x256xf32>
    tpu.vector_store %arg15[%c0_54, %c0_55], %114 {strides = array<i32>} : memref<8x256xf32, #tpu.memory_space<vmem>>, vector<8x256xf32>,
    return
  }
}

</mosaic_0001>

<bundles_post_ra>
// kernel: generator_forward.1
= control target key start
LH: loop header
LB: loop body
LE: loop exit
PB: predicated region body
PF: predicated region fallthrough
CT: control target
= control target key end

     0   :  { %20 = vsyncpa [#allocation6], 0  ;;  %s5300_s0 = inlined_call_operand.vmem [shape: s32[8,1], index: 0, kind: input, shape index: {}]   ;;  %s5301_s1 = inlined_call_operand.vmem [shape: f32[8,32], index: 1, kind: input, shape index: {}]   ;;  %s5302_s2 = inlined_call_operand.hbm [shape: f32[10,32], index: 2, kind: input, shape index: {}]   ;;  %s5303_s3 = inlined_call_operand.vmem [shape: bf16[32,256], index: 3, kind: input, shape index: {}]   ;;  %s5304_s4 = inlined_call_operand.hbm [shape: bf16[32,256], index: 4, kind: input, shape index: {}]   ;;  %s5305_s5 = inlined_call_operand.vmem [shape: f32[1,256], index: 5, kind: input, shape index: {}]   ;;  %s5306_s6 = inlined_call_operand.hbm [shape: f32[1,256], index: 6, kind: input, shape index: {}]   ;;  %s5307_s7 = inlined_call_operand.hbm [shape: bf16[256,512], index: 7, kind: input, shape index: {}]   ;;  %s5308_s8 = inlined_call_operand.vmem [shape: f32[1,512], index: 8, kind: input, shape index: {}]   ;;  %s5309_s9 = inlined_call_operand.hbm [shape: f32[1,512], index: 9, kind: input, shape index: {}]   ;;  %s5310_s10 = inlined_call_operand.hbm [shape: bf16[512,1024], index: 10, kind: input, shape index: {}]   ;;  %s5311_s11 = inlined_call_operand.hbm [shape: f32[1,1024], index: 11, kind: input, shape index: {}]   ;;  %s5312_s12 = inlined_call_operand.hbm [shape: f32[1,1024], index: 12, kind: input, shape index: {}]   ;;  %s5313_s13 = inlined_call_operand.hbm [shape: bf16[1024,256], index: 13, kind: input, shape index: {}]   ;;  %s5314_s14 = inlined_call_operand.hbm [shape: f32[1,256], index: 14, kind: input, shape index: {}]   ;;  %s5315_s15 = inlined_call_operand.vmem [shape: f32[8,256], index: 15, kind: output, shape index: {}]  }
   0x1   :  { %21 = vsyncpa [#allocation8], 0 }
   0x2   :  { %22 = vsyncpa [#allocation11], 0 }
   0x3   :  { %23 = vsyncpa [#allocation14], 0 }
   0x4   :  { %24 = vsyncpa [#allocation17], 0  ;;  %s4818_s18 = smov [#allocation7]   ;;  %s4819_s20 = smov [#allocation10]  }
   0x5   :  { %s48_s19 = sshll.u32 %s4818_s18, 4  ;;  %s72_s21 = sshll.u32 %s4819_s20, 4  ;;  %s49_s19 = int_to_ptr.vmem [resolvable:$true] %s48_s19  ;;  %s4927_s21 = int_to_ptr.vmem [resolvable:$true] %s72_s21 }
   0x6   :  { %s4628_s24 = scalar_lea.hbm %s5304_s4, 512 }
   0x7   :  { %p4629_p0 = scmp.ne.s32.totalorder %s5304_s4, %s4628_s24  ;;  %p4632_p1 = scmp.lt.u32.totalorder %s4628_s24, %s5304_s4 }
   0x9   :  { %p4634_p2 = pnand %p4632_p1, %p4629_p0 }
   0xb   :  { %4637 = shalt.err (!%p4634_p2)
}
   0xc   :  { %s4638_s29 = scalar_lea.vmem %s49_s19, 512  ;;  %p4643_p4 = scmp.lt.s32.totalorder %s49_s19, %s49_s19 }
   0xd   :  { %p4639_p3 = scmp.ne.s32.totalorder %s49_s19, %s4638_s29  ;;  %p4644_p5 = scmp.lt.s32.totalorder %s4638_s29, %s4638_s29 }
   0xf   :  { %p4645_p6 = por %p4644_p5, %p4643_p4 }
  0x11   :  { %p4646_p7 = pnand %p4645_p6, %p4639_p3 }
  0x13   :  { %4649 = shalt.err (!%p4646_p7)
}
  0x14   :  { %s5316_s30 = smov 128   ;;  %s5318_s16 = smov 8  }
  0x15   :  { %54 = dma.hbm_to_vmem [thread:$0]  %s5304_s4, 512, %s49_s19, [#allocation8], %s5316_s30, %s5316_s30, %s5318_s16  }
  0x16   :  { %s4650_s23 = scalar_lea.hbm %s5307_s7, 8192 }
  0x17   :  { %p4651_p8 = scmp.ne.s32.totalorder %s5307_s7, %s4650_s23  ;;  %p4654_p9 = scmp.lt.u32.totalorder %s4650_s23, %s5307_s7 }
  0x19   :  { %p4656_p10 = pnand %p4654_p9, %p4651_p8 }
  0x1b   :  { %4659 = shalt.err (!%p4656_p10)
}
  0x1c   :  { %s4660_s28 = scalar_lea.vmem %s4927_s21, 8192  ;;  %p4665_p12 = scmp.lt.s32.totalorder %s4927_s21, %s4927_s21 }
  0x1d   :  { %p4661_p11 = scmp.ne.s32.totalorder %s4927_s21, %s4660_s28  ;;  %p4666_p13 = scmp.lt.s32.totalorder %s4660_s28, %s4660_s28 }
  0x1f   :  { %p4667_p0 = por %p4666_p13, %p4665_p12 }
  0x21   :  { %p4668_p1 = pnand %p4667_p0, %p4661_p11 }
  0x23   :  { %4671 = shalt.err (!%p4668_p1)
}
  0x24   :  { %s4822_s4 = smov 256   ;;  %s4823_s19 = smov 16  }
  0x25   :  { %78 = dma.hbm_to_vmem [thread:$0]  %s5307_s7, 8192, %s4927_s21, [#allocation11], %s4822_s4, %s4822_s4, %s4823_s19  }
  0x26   :  { %s4824_s18 = smov [#allocation13]   ;;  %s4825_s22 = smov [#allocation5]  }
  0x27   :  { %s97_s20 = sshll.u32 %s4824_s18, 4  ;;  %s34_s23 = sshll.u32 %s4825_s22, 4  ;;  %s98_s20 = int_to_ptr.vmem [resolvable:$true] %s97_s20  ;;  %s4963_s23 = int_to_ptr.vmem [resolvable:$true] %s34_s23 }
  0x28   :  { %s4672_s26 = scalar_lea.hbm %s5311_s11, 128 }
  0x29   :  { %p4673_p2 = scmp.ne.s32.totalorder %s5311_s11, %s4672_s26  ;;  %p4676_p3 = scmp.lt.u32.totalorder %s4672_s26, %s5311_s11 }
  0x2b   :  { %p4678_p4 = pnand %p4676_p3, %p4673_p2 }
  0x2d   :  { %4681 = shalt.err (!%p4678_p4)
}
  0x2e   :  { %s4682_s7 = scalar_lea.vmem %s98_s20, 128  ;;  %p4687_p6 = scmp.lt.s32.totalorder %s98_s20, %s98_s20 }
  0x2f   :  { %p4683_p5 = scmp.ne.s32.totalorder %s98_s20, %s4682_s7  ;;  %p4688_p7 = scmp.lt.s32.totalorder %s4682_s7, %s4682_s7 }
  0x31   :  { %p4689_p8 = por %p4688_p7, %p4687_p6 }
  0x33   :  { %p4690_p9 = pnand %p4689_p8, %p4683_p5 }
  0x35   :  { %4693 = shalt.err (!%p4690_p9)
}
  0x36   :  { %100 = dma.hbm_to_vmem [thread:$0]  %s5311_s11, 128, %s98_s20, [#allocation14]  }
  0x37   :  { %s4694_s18 = scalar_lea.hbm %s5302_s2, 256 }
  0x38   :  { %p4695_p10 = scmp.ne.s32.totalorder %s5302_s2, %s4694_s18  ;;  %p4698_p11 = scmp.lt.u32.totalorder %s4694_s18, %s5302_s2 }
  0x3a   :  { %p4700_p12 = pnand %p4698_p11, %p4695_p10 }
  0x3c   :  { %4703 = shalt.err (!%p4700_p12)
}
  0x3d   :  { %s4704_s25 = scalar_lea.vmem %s4963_s23, 256  ;;  %p4709_p0 = scmp.lt.s32.totalorder %s4963_s23, %s4963_s23 }
  0x3e   :  { %p4705_p13 = scmp.ne.s32.totalorder %s4963_s23, %s4704_s25  ;;  %p4710_p1 = scmp.lt.s32.totalorder %s4704_s25, %s4704_s25 }
  0x40   :  { %p4711_p2 = por %p4710_p1, %p4709_p0 }
  0x42   :  { %p4712_p3 = pnand %p4711_p2, %p4705_p13 }
  0x44   :  { %4715 = shalt.err (!%p4712_p3)
}
  0x45   :  { %s5320_s11 = smov 8   ;;  %s5321_s20 = smov 128  }
  0x46   :  { %40 = dma.hbm_to_vmem [thread:$0]  %s5302_s2, 256, %s4963_s23, [#allocation6], %s5321_s20, %s5321_s20, %s5320_s11  }
  0x47   :  { %s4826_s28 = smov [#allocation9]   ;;  %s4827_s21 = smov [#allocation12]  }
  0x48   :  { %s63_s7 = sshll.u32 %s4826_s28, 4  ;;  %s87_s19 = sshll.u32 %s4827_s21, 4  ;;  %s64_s7 = int_to_ptr.vmem [resolvable:$true] %s63_s7  ;;  %s88_s19 = int_to_ptr.vmem [resolvable:$true] %s87_s19 }
  0x49   :  { %s4716_s18 = scalar_lea.hbm %s5306_s6, 32 }
  0x4a   :  { %p4717_p4 = scmp.ne.s32.totalorder %s5306_s6, %s4716_s18  ;;  %p4720_p5 = scmp.lt.u32.totalorder %s4716_s18, %s5306_s6 }
  0x4c   :  { %p4722_p6 = pnand %p4720_p5, %p4717_p4 }
  0x4e   :  { %4725 = shalt.err (!%p4722_p6)
}
  0x4f   :  { %s4726_s2 = scalar_lea.vmem %s64_s7, 32  ;;  %p4731_p8 = scmp.lt.s32.totalorder %s64_s7, %s64_s7 }
  0x50   :  { %p4727_p7 = scmp.ne.s32.totalorder %s64_s7, %s4726_s2  ;;  %p4732_p9 = scmp.lt.s32.totalorder %s4726_s2, %s4726_s2 }
  0x52   :  { %p4733_p10 = por %p4732_p9, %p4731_p8 }
  0x54   :  { %p4734_p11 = pnand %p4733_p10, %p4727_p7 }
  0x56   :  { %4737 = shalt.err (!%p4734_p11)
}
  0x57   :  { %66 = dma.hbm_to_vmem [thread:$0]  %s5306_s6, 32, %s64_s7, [#allocation8]  }
  0x58   :  { %s4738_s28 = scalar_lea.hbm %s5309_s9, 64 }
  0x59   :  { %p4739_p12 = scmp.ne.s32.totalorder %s5309_s9, %s4738_s28  ;;  %p4742_p13 = scmp.lt.u32.totalorder %s4738_s28, %s5309_s9 }
  0x5b   :  { %p4744_p0 = pnand %p4742_p13, %p4739_p12 }
  0x5d   :  { %4747 = shalt.err (!%p4744_p0)
}
  0x5e   :  { %s4748_s22 = scalar_lea.vmem %s88_s19, 64  ;;  %p4753_p2 = scmp.lt.s32.totalorder %s88_s19, %s88_s19 }
  0x5f   :  { %p4749_p1 = scmp.ne.s32.totalorder %s88_s19, %s4748_s22  ;;  %p4754_p3 = scmp.lt.s32.totalorder %s4748_s22, %s4748_s22 }
  0x61   :  { %p4755_p4 = por %p4754_p3, %p4753_p2 }
  0x63   :  { %p4756_p5 = pnand %p4755_p4, %p4749_p1 }
  0x65   :  { %4759 = shalt.err (!%p4756_p5)
}
  0x66   :  { %90 = dma.hbm_to_vmem [thread:$0]  %s5309_s9, 64, %s88_s19, [#allocation11]  }
  0x67   :  { %s4828_s30 = smov [#allocation15]   ;;  %s4829_s24 = smov [#allocation16]  }
  0x68   :  { %s107_s16 = sshll.u32 %s4828_s30, 4  ;;  %s117_s2 = sshll.u32 %s4829_s24, 4  ;;  %s108_s16 = int_to_ptr.vmem [resolvable:$true] %s107_s16  ;;  %s118_s2 = int_to_ptr.vmem [resolvable:$true] %s117_s2 }
  0x69   :  { %s4760_s26 = scalar_lea.hbm %s5312_s12, 128 }
  0x6a   :  { %p4761_p6 = scmp.ne.s32.totalorder %s5312_s12, %s4760_s26  ;;  %p4764_p7 = scmp.lt.u32.totalorder %s4760_s26, %s5312_s12 }
  0x6c   :  { %p4766_p8 = pnand %p4764_p7, %p4761_p6 }
  0x6e   :  { %4769 = shalt.err (!%p4766_p8)
}
  0x6f   :  { %s4770_s9 = scalar_lea.vmem %s108_s16, 128  ;;  %p4775_p10 = scmp.lt.s32.totalorder %s108_s16, %s108_s16 }
  0x70   :  { %p4771_p9 = scmp.ne.s32.totalorder %s108_s16, %s4770_s9  ;;  %p4776_p11 = scmp.lt.s32.totalorder %s4770_s9, %s4770_s9 }
  0x72   :  { %p4777_p12 = por %p4776_p11, %p4775_p10 }
  0x74   :  { %p4778_p13 = pnand %p4777_p12, %p4771_p9 }
  0x76   :  { %4781 = shalt.err (!%p4778_p13)
}
  0x77   :  { %110 = dma.hbm_to_vmem [thread:$0]  %s5312_s12, 128, %s108_s16, [#allocation14]  }
  0x78   :  { %s4782_s6 = scalar_lea.hbm %s5314_s14, 32 }
  0x79   :  { %p4783_p0 = scmp.ne.s32.totalorder %s5314_s14, %s4782_s6  ;;  %p4786_p1 = scmp.lt.u32.totalorder %s4782_s6, %s5314_s14 }
  0x7b   :  { %p4788_p2 = pnand %p4786_p1, %p4783_p0 }
  0x7d   :  { %4791 = shalt.err (!%p4788_p2)
}
  0x7e   :  { %s4792_s25 = scalar_lea.vmem %s118_s2, 32  ;;  %p4797_p4 = scmp.lt.s32.totalorder %s118_s2, %s118_s2 }
  0x7f   :  { %p4793_p3 = scmp.ne.s32.totalorder %s118_s2, %s4792_s25  ;;  %p4798_p5 = scmp.lt.s32.totalorder %s4792_s25, %s4792_s25 }
  0x81   :  { %p4799_p6 = por %p4798_p5, %p4797_p4 }
  0x83   :  { %p4800_p7 = pnand %p4799_p6, %p4793_p3 }
  0x85   :  { %4803 = shalt.err (!%p4800_p7)
}
  0x86   :  { %120 = dma.hbm_to_vmem [thread:$0]  %s5314_s14, 32, %s118_s2, [#allocation17]  }
  0x87   :  { %4804 = dma.done.wait [#allocation6], 256  }
  0x88   :  { %4805 = vsyncadd [#allocation6], 4294967040 }
  0x89   :  { %4806 = dma.done.wait [#allocation8], 544  }
  0x8a   :  { %4807 = vsyncadd [#allocation8], 4294966752 }
  0x8b   :  { %4808 = dma.done.wait [#allocation11], 8256  }
  0x8c   :  { %4809 = vsyncadd [#allocation11], 4294959040 }
  0x8d   :  { %4810 = dma.done.wait [#allocation14], 256  }
  0x8e   :  { %4811 = vsyncadd [#allocation14], 4294967040 }
  0x8f   :  { %4812 = dma.done.wait [#allocation17], 32  }
  0x90   :  { %4813 = vsyncadd [#allocation17], 4294967264  ;;  %s149_s26 = sld [smem:[#allocation0]]   ;;  %s4830_s27 = smov 1024   ;;  %v4831_v0 = vmov 0   ;;  %v4832_v1 = vmov 0.0|0.0   ;;  %v216_v12 = vlaneseq }
  0x91   :  { %161 = sst [smem:[#allocation19]] %s4830_s27  ;;  %4487 = vset.pattern.permute.xlu0 %v4831_v0  ;;  %3452 = vmatprep.subr.bf16.mxu0 %v4832_v1  ;;  %v4833_v2 = vmov 0.0   ;;  %s4834_s14 = smov [#allocation2]   ;;  %vm230_vm0 = vcmask 1041408   ;;  %vm4844_vm1 = vmmov 1   ;;  %vm4845_vm3 = vmmov 0  }
  0x92   :  { %163 = sst [smem:[#allocation19 + $0x1]] %s4830_s27  ;;  %471 = vmatprep.mubr.f32.mxu1 %v4833_v2  ;;  %s157_s2 = sshll.u32 %s4834_s14, 4  ;;  %vm3454_vm2 = vmpackc.low %vm230_vm0, %vm4844_vm1  ;;  %3449 = vmatprep.mubr.msk.f32.mxu0 %vm4845_vm3, %v4833_v2  ;;  %v217_v13 = vand.u32 127, %v216_v12  ;;  %vm226_vm4 = vcmask 80896   ;;  %vm329_vm6 = vcmask 261120   ;;  %s158_s2 = int_to_ptr.vmem [resolvable:$true] %s157_s2 }
  0x93   :  { %165 = sst [smem:[#allocation19 + $0x2]] %s5320_s11  ;;  %s4835_s28 = smov 512  }
  0x94   :  { %169 = sst [smem:[#allocation19 + $0x4]] %s5321_s20  ;;  %s4836_s21 = smov 64  }
  0x95   :  { %173 = sst [smem:[#allocation19 + $0x6]] %s4835_s28  ;;  %s4837_s9 = smov 2  }
  0x96   :  { %167 = sst [smem:[#allocation19 + $0x3]] %s4836_s21  ;;  %s3431_s29 = sshll.u32 %s149_s26, 26 }
  0x97   :  { %171 = sst [smem:[#allocation19 + $0x5]] %s4837_s9  ;;  %s3432_s19 = sadd.s32 134217728, %s3431_s29 }
  0x98   :  { %175 = sst [smem:[#allocation19 + $0x7]] %s4836_s21  ;;  %s4838_s17 = smov 4  }
  0x99   :  { %177 = sst [smem:[#allocation19 + $0x8]] %s4838_s17  ;;  %s4839_s18 = smov [#allocation4]  }
  0x9a   :  { %s4840_s22 = smov [#allocation18]   ;;  %s4841_s7 = smov [#allocation3]  }
  0x9b   :  { %179 = dma.general %s5310_s10, 32768, %s158_s2, %s4839_s18, %s4840_s22, [#allocation19], %s3432_s19, 0  }
  0x9c   :  { %196 = sst [smem:[#allocation21]] %s4822_s4  ;;  %s192_s30 = sshll.u32 %s4841_s7, 4  ;;  %s193_s30 = int_to_ptr.vmem [resolvable:$true] %s192_s30 }
  0x9d   :  { %198 = sst [smem:[#allocation21 + $0x1]] %s4822_s4  ;;  %s4842_s24 = smov [#allocation4 + $0x1]  }
  0x9e   :  { %200 = sst [smem:[#allocation21 + $0x2]] %s4837_s9  ;;  %s4843_s23 = smov [#allocation20]  }
  0x9f   :  { %202 = sst [smem:[#allocation21 + $0x3]] %s4836_s21 }
  0xa0   :  { %204 = sst [smem:[#allocation21 + $0x4]] %s5321_s20 }
  0xa1   :  { %206 = sst [smem:[#allocation21 + $0x5]] %s4837_s9 }
  0xa2   :  { %208 = sst [smem:[#allocation21 + $0x6]] %s5321_s20 }
  0xa3   :  { %210 = sst [smem:[#allocation21 + $0x7]] %s4836_s21 }
  0xa4   :  { %212 = sst [smem:[#allocation21 + $0x8]] %s4838_s17 }
  0xa5   :  { %214 = dma.general %s5313_s13, 16384, %s193_s30, %s4842_s24, %s4843_s23, [#allocation21], %s3432_s19, 0  }
  0xa6   :  { %v215_v3 = vld [vmem:[%s5300_s0] sm:$0xff]  ;;  %v225_v5 = vld [vmem:[#allocation5 + $0x8] sm:$0x3]  ;;  %v4490_v8 = vld [vmem:[#allocation7 + $0x4] ss:$8 sps:$4 sm:$0xff]  }
  0xa7   :  { %v224_v4 = vld [vmem:[#allocation5] sm:$0xff]  ;;  %219 = vperm.xlu0 %4487, %v215_v3   ;;  %v4494_v10 = vld [vmem:[%s5303_s3 + $0x14] ss:$8 sps:$4 sm:$0xff]   ;;  %v4499_v11 = vld [vmem:[%s5303_s3 + $0x10] ss:$8 sps:$4 sm:$0xff]  }
  0xa8   :  { %v3453_v6 = vpack.c.bf16 %v225_v5, %v224_v4  ;;  %v4488_v7 = vld [vmem:[%s5303_s3 + $0x4] ss:$8 sps:$4 sm:$0xff]   ;;  %v4493_v9 = vld [vmem:[%s5303_s3] ss:$8 sps:$4 sm:$0xff]   ;;  %v4492_v15 = vld [vmem:[#allocation7] ss:$8 sps:$4 sm:$0xff]  }
  0xa9   :  { %3465 = vmatprep.subr.bf16.mxu1 %v4488_v7  ;;  %v4496_v16 = vld [vmem:[#allocation7 + $0x14] ss:$8 sps:$4 sm:$0xff]   ;;  %v4498_v18 = vld [vmem:[#allocation7 + $0x10] ss:$8 sps:$4 sm:$0xff]  }
  0xaa   :  { %3455 = vmatpush3.bf16.msk.msra.mxu0 %vm3454_vm2, %v3453_v6  ;;  %3467 = vmatpush1.bf16.msra.mxu1 %v4493_v9  ;;  %v304_v19 = vld [vmem:[%s5301_s1] sm:$0xff] }
  0xab   :  { %3457 = vmatprep.subr.bf16.mxu0 %v4490_v8  ;;  %3469 = vmatprep.subr.bf16.mxu1 %v4494_v10  ;;  %v4500_v24 = vld [vmem:[#allocation10 + $0x4] ss:$16 sps:$4 sm:$0xff]   ;;  %v4502_v25 = vld [vmem:[#allocation10] ss:$16 sps:$4 sm:$0xff]   ;;  %v4548_v56 = vld [vmem:[#allocation10 + $0xc] ss:$16 sps:$4 sm:$0xff]  }
  0xac   :  { %v4503_v26 = vld [vmem:[#allocation10 + $0x24] ss:$16 sps:$4 sm:$0xff]   ;;  %v4505_v27 = vld [vmem:[#allocation10 + $0x20] ss:$16 sps:$4 sm:$0xff]  }
  0xad   :  { %v4506_v28 = vld [vmem:[#allocation10 + $0x44] ss:$16 sps:$4 sm:$0xff]   ;;  %v4508_v29 = vld [vmem:[#allocation10 + $0x40] ss:$16 sps:$4 sm:$0xff]  }
  0xae   :  { %3471 = vmatpush1.bf16.msra.mxu1 %v4499_v11  ;;  %v4509_v30 = vld [vmem:[#allocation10 + $0x64] ss:$16 sps:$4 sm:$0xff]   ;;  %v4511_v31 = vld [vmem:[#allocation10 + $0x60] ss:$16 sps:$4 sm:$0xff]  }
  0xaf   :  { %3473 = vmatprep.subr.bf16.mxu1 %v4500_v24  ;;  %v4512_v32 = vld [vmem:[#allocation10 + $0x84] ss:$16 sps:$4 sm:$0xff]   ;;  %v4514_v33 = vld [vmem:[#allocation10 + $0x80] ss:$16 sps:$4 sm:$0xff]  }
  0xb0   :  { %v4515_v34 = vld [vmem:[#allocation10 + $0xa4] ss:$16 sps:$4 sm:$0xff]   ;;  %v4517_v35 = vld [vmem:[#allocation10 + $0xa0] ss:$16 sps:$4 sm:$0xff]  }
  0xb1   :  { %3439 = vmatmul.mubr.msk.f32.vlgmr.msra.gmra.mrb[0].mxu1 %vm329_vm6, %v304_v19  ;;  %v4518_v36 = vld [vmem:[#allocation10 + $0xc4] ss:$16 sps:$4 sm:$0xff]   ;;  %v4520_v37 = vld [vmem:[#allocation10 + $0xc0] ss:$16 sps:$4 sm:$0xff]  }
  0xb2   :  { %3475 = vmatpush1.bf16.msra.mxu1 %v4502_v25  ;;  %v4521_v38 = vld [vmem:[#allocation10 + $0xe4] ss:$16 sps:$4 sm:$0xff]   ;;  %v4523_v39 = vld [vmem:[#allocation10 + $0xe0] ss:$16 sps:$4 sm:$0xff]  }
  0xb3   :  { %3477 = vmatprep.subr.bf16.mxu1 %v4503_v26  ;;  %v4524_v40 = vld [vmem:[#allocation10 + $0x104] ss:$16 sps:$4 sm:$0xff]   ;;  %v4526_v41 = vld [vmem:[#allocation10 + $0x100] ss:$16 sps:$4 sm:$0xff]  }
  0xb4   :  { %v4527_v42 = vld [vmem:[#allocation10 + $0x124] ss:$16 sps:$4 sm:$0xff]   ;;  %v4529_v43 = vld [vmem:[#allocation10 + $0x120] ss:$16 sps:$4 sm:$0xff]  }
  0xb5   :  { %v4530_v44 = vld [vmem:[#allocation10 + $0x144] ss:$16 sps:$4 sm:$0xff]   ;;  %v4532_v45 = vld [vmem:[#allocation10 + $0x140] ss:$16 sps:$4 sm:$0xff]  }
  0xb6   :  { %3479 = vmatpush1.bf16.msra.mxu1 %v4505_v27  ;;  %v4533_v46 = vld [vmem:[#allocation10 + $0x164] ss:$16 sps:$4 sm:$0xff]   ;;  %v4535_v47 = vld [vmem:[#allocation10 + $0x160] ss:$16 sps:$4 sm:$0xff]  }
  0xb7   :  { %3481 = vmatprep.subr.bf16.mxu1 %v4506_v28  ;;  %v4536_v48 = vld [vmem:[#allocation10 + $0x184] ss:$16 sps:$4 sm:$0xff]   ;;  %v4538_v49 = vld [vmem:[#allocation10 + $0x180] ss:$16 sps:$4 sm:$0xff]  }
  0xb8   :  { %v4539_v50 = vld [vmem:[#allocation10 + $0x1a4] ss:$16 sps:$4 sm:$0xff]   ;;  %v4541_v51 = vld [vmem:[#allocation10 + $0x1a0] ss:$16 sps:$4 sm:$0xff]  }
  0xb9   :  { %v4542_v52 = vld [vmem:[#allocation10 + $0x1c4] ss:$16 sps:$4 sm:$0xff]   ;;  %v4544_v53 = vld [vmem:[#allocation10 + $0x1c0] ss:$16 sps:$4 sm:$0xff]  }
  0xba   :  { %3483 = vmatpush1.bf16.msra.mxu1 %v4508_v29  ;;  %v4545_v54 = vld [vmem:[#allocation10 + $0x1e4] ss:$16 sps:$4 sm:$0xff]   ;;  %v4547_v55 = vld [vmem:[#allocation10 + $0x1e0] ss:$16 sps:$4 sm:$0xff]  }
  0xbb   :  { %3485 = vmatprep.subr.bf16.mxu1 %v4509_v30 }
  0xbe   :  { %3487 = vmatpush1.bf16.msra.mxu1 %v4511_v31 }
  0xbf   :  { %3489 = vmatprep.subr.bf16.mxu1 %v4512_v32  ;;  %v4846_v32 = vmov 1966171168  }
  0xc2   :  { %3491 = vmatpush1.bf16.msra.mxu1 %v4514_v33  ;;  %v520_v33 = vunpack.c.l.s4 %v4846_v32 }
  0xc3   :  { %3493 = vmatprep.subr.bf16.mxu1 %v4515_v34 }
  0xc4   :  { %v521_v34 = vunpack.c.0.s8 %v520_v33 }
  0xc6   :  { %3495 = vmatpush1.bf16.msra.mxu1 %v4517_v35  ;;  %v5087_v35 = vshrl.u32 %v216_v12, 7 }
  0xc7   :  { %3497 = vmatprep.subr.bf16.mxu1 %v4518_v36 }
  0xc8   :  { %v5101_v12 = vsub.s32 1, %v5087_v35 }
  0xca   :  { %3499 = vmatpush1.bf16.msra.mxu1 %v4520_v37  ;;  %v5090_v37 = vsub.s32 %v521_v34, %v5087_v35 }
  0xcb   :  { %3501 = vmatprep.subr.bf16.mxu1 %v4521_v38 }
  0xce   :  { %3503 = vmatpush1.bf16.msra.mxu1 %v4523_v39 }
  0xcf   :  { %3505 = vmatprep.subr.bf16.mxu1 %v4524_v40 }
  0xd2   :  { %3507 = vmatpush1.bf16.msra.mxu1 %v4526_v41  ;;  %v511_v41 = vld [vmem:[%s5305_s5] sm:$0x3] }
  0xd3   :  { %3509 = vmatprep.subr.bf16.mxu1 %v4527_v42  ;;  %v5097_v42 = vsub.s32 0, %v5087_v35 }
  0xd6   :  { %3511 = vmatpush1.bf16.msra.mxu1 %v4529_v43 }
  0xd7   :  { %3513 = vmatprep.subr.bf16.mxu1 %v4530_v44  ;;  %v548_v44 = vld [vmem:[#allocation9] sm:$0x3] }
  0xda   :  { %3515 = vmatpush1.bf16.msra.mxu1 %v4532_v45 }
  0xdb   :  { %3517 = vmatprep.subr.bf16.mxu1 %v4533_v46 }
  0xde   :  { %3519 = vmatpush1.bf16.msra.mxu1 %v4535_v47 }
  0xdf   :  { %3521 = vmatprep.subr.bf16.mxu1 %v4536_v48  ;;  %v553_v48 = vrot.slane %v548_v44, %v5097_v42 }
  0xe2   :  { %3523 = vmatpush1.bf16.msra.mxu1 %v4538_v49  ;;  %v557_v49 = vrot.slane %v548_v44, %v5101_v12 }
  0xe3   :  { %3525 = vmatprep.subr.bf16.mxu1 %v4539_v50 }
  0xe6   :  { %3527 = vmatpush1.bf16.msra.mxu1 %v4541_v51 }
  0xe7   :  { %3529 = vmatprep.subr.bf16.mxu1 %v4542_v52 }
  0xea   :  { %3531 = vmatpush1.bf16.msra.mxu1 %v4544_v53 }
  0xeb   :  { %3533 = vmatprep.subr.bf16.mxu1 %v4545_v54 }
  0xee   :  { %3535 = vmatpush1.bf16.msra.mxu1 %v4547_v55 }
  0xef   :  { %3537 = vmatprep.subr.bf16.mxu1 %v4548_v56 }
 0x126   :  { %v220_v14 = vpop.permute.xlu0 %219 }
 0x127   :  { %vm221_vm5 = vcmp.eq.s32.totalorder %v220_v14, %v217_v13 }
 0x128   :  { %v3435_v17 = vsel %vm221_vm5, 1.0, %v4833_v2 }
 0x129   :  { %3450 = vmatmul.mubr.msk.f32.vlgmr.msra.gmra.mrb[0].mxu0 %vm226_vm4, %v3435_v17 }
 0x12a   :  { %3459 = vmatpush1.bf16.msra.mxu0 %v4492_v15  ;;  %397 = vmatprep.mubr.f32.mxu0 %v4833_v2 }
 0x12b   :  { %3461 = vmatprep.subr.bf16.mxu0 %v4496_v16 }
 0x12e   :  { %3463 = vmatpush1.bf16.msra.mxu0 %v4498_v18 }
 0x184   :  { %v5080_v22 = vpop.f32.mrb[0].mxu1 }
 0x185   :  { %v5082_v23 = vpop.f32.mrb[1].mxu1 }
 0x1fc   :  { %v300_v20 = vpop.f32.mrb[0].mxu0 }
 0x1fd   :  { %v3451_v21 = vpop.f32.mrb[1].mxu0  ;;  %3438 = vmatmul.mubr.msk.f32.vlgmr.msra.gmra.mrb[2].mxu0 %vm329_vm6, %v300_v20 }
 0x2d0   :  { %v399_v57 = vpop.f32.mrb[2].mxu0 }
 0x2d1   :  { %v474_v58 = vadd.f32 %v5080_v22, %v399_v57  ;;  %v401_v59 = vpop.f32.mrb[3].mxu0  ;;  %v4550_v57 = vld [vmem:[#allocation10 + $0x8] ss:$16 sps:$4 sm:$0xff]  }
 0x2d2   :  { %v476_v60 = vadd.f32 %v5082_v23, %v401_v59  ;;  %v4551_v59 = vld [vmem:[#allocation10 + $0x2c] ss:$16 sps:$4 sm:$0xff]  }
 0x2d3   :  { %v478_v61 = vrot.slane %v474_v58, 4 }
 0x2d4   :  { %v484_v62 = vrot.slane %v476_v60, 4 }
 0x2d5   :  { %v479_v63 = vadd.f32 %v478_v61, %v474_v58  ;;  %v4554_v61 = vld [vmem:[#allocation10 + $0x4c] ss:$16 sps:$4 sm:$0xff]  }
 0x2d6   :  { %v485_v0 = vadd.f32 %v484_v62, %v476_v60  ;;  %v4556_v62 = vld [vmem:[#allocation10 + $0x48] ss:$16 sps:$4 sm:$0xff]  }
 0x2d7   :  { %v480_v1 = vrot.slane %v479_v63, 2 }
 0x2d8   :  { %v486_v2 = vrot.slane %v485_v0, 2 }
 0x2d9   :  { %v481_v3 = vadd.f32 %v480_v1, %v479_v63  ;;  %v4557_v63 = vld [vmem:[#allocation10 + $0x6c] ss:$16 sps:$4 sm:$0xff]  }
 0x2da   :  { %v487_v4 = vadd.f32 %v486_v2, %v485_v0  ;;  %v4559_v0 = vld [vmem:[#allocation10 + $0x68] ss:$16 sps:$4 sm:$0xff]   ;;  %v4560_v1 = vld [vmem:[#allocation10 + $0x8c] ss:$16 sps:$4 sm:$0xff]  }
 0x2db   :  { %v482_v5 = vrot.slane %v481_v3, 1  ;;  %v4562_v2 = vld [vmem:[#allocation10 + $0x88] ss:$16 sps:$4 sm:$0xff]  }
 0x2dc   :  { %v488_v6 = vrot.slane %v487_v4, 1 }
 0x2dd   :  { %v483_v7 = vadd.f32 %v482_v5, %v481_v3  ;;  %v4563_v3 = vld [vmem:[#allocation10 + $0xac] ss:$16 sps:$4 sm:$0xff]  }
 0x2de   :  { %v489_v8 = vadd.f32 %v488_v6, %v487_v4  ;;  %v4565_v4 = vld [vmem:[#allocation10 + $0xa8] ss:$16 sps:$4 sm:$0xff]   ;;  %v4566_v5 = vld [vmem:[#allocation10 + $0xcc] ss:$16 sps:$4 sm:$0xff]  }
 0x2df   :  { %v491_v9 = vmul.f32 0.125, %v483_v7  ;;  %v4568_v6 = vld [vmem:[#allocation10 + $0xc8] ss:$16 sps:$4 sm:$0xff]   ;;  %v4569_v7 = vld [vmem:[#allocation10 + $0xec] ss:$16 sps:$4 sm:$0xff]  }
 0x2e0   :  { %v492_v10 = vmul.f32 0.125, %v489_v8  ;;  %v4571_v8 = vld [vmem:[#allocation10 + $0xe8] ss:$16 sps:$4 sm:$0xff]  }
 0x2e1   :  { %v493_v11 = vsub.f32 %v474_v58, %v491_v9  ;;  %v4572_v9 = vld [vmem:[#allocation10 + $0x10c] ss:$16 sps:$4 sm:$0xff]  }
 0x2e2   :  { %v494_v13 = vsub.f32 %v476_v60, %v492_v10  ;;  %v4553_v60 = vld [vmem:[#allocation10 + $0x28] ss:$16 sps:$4 sm:$0xff]  }
 0x2e3   :  { %v495_v14 = vmul.f32 %v493_v11, %v493_v11  ;;  %v4574_v10 = vld [vmem:[#allocation10 + $0x108] ss:$16 sps:$4 sm:$0xff]  }
 0x2e4   :  { %v496_v15 = vmul.f32 %v494_v13, %v494_v13 }
 0x2e5   :  { %v497_v16 = vrot.slane %v495_v14, 4 }
 0x2e6   :  { %v503_v17 = vrot.slane %v496_v15, 4 }
 0x2e7   :  { %v498_v18 = vadd.f32 %v497_v16, %v495_v14  ;;  %v4578_v14 = vld [vmem:[#allocation10 + $0x14c] ss:$16 sps:$4 sm:$0xff]  }
 0x2e8   :  { %v504_v19 = vadd.f32 %v503_v17, %v496_v15  ;;  %v4580_v15 = vld [vmem:[#allocation10 + $0x148] ss:$16 sps:$4 sm:$0xff]   ;;  %v4581_v16 = vld [vmem:[#allocation10 + $0x16c] ss:$16 sps:$4 sm:$0xff]  }
 0x2e9   :  { %v499_v20 = vrot.slane %v498_v18, 2  ;;  %v4583_v17 = vld [vmem:[#allocation10 + $0x168] ss:$16 sps:$4 sm:$0xff]  }
 0x2ea   :  { %v505_v21 = vrot.slane %v504_v19, 2 }
 0x2eb   :  { %v500_v22 = vadd.f32 %v499_v20, %v498_v18  ;;  %v4584_v18 = vld [vmem:[#allocation10 + $0x18c] ss:$16 sps:$4 sm:$0xff]  }
 0x2ec   :  { %v506_v23 = vadd.f32 %v505_v21, %v504_v19  ;;  %v4586_v19 = vld [vmem:[#allocation10 + $0x188] ss:$16 sps:$4 sm:$0xff]   ;;  %v4587_v20 = vld [vmem:[#allocation10 + $0x1ac] ss:$16 sps:$4 sm:$0xff]  }
 0x2ed   :  { %v501_v24 = vrot.slane %v500_v22, 1  ;;  %v4589_v21 = vld [vmem:[#allocation10 + $0x1a8] ss:$16 sps:$4 sm:$0xff]  }
 0x2ee   :  { %v507_v25 = vrot.slane %v506_v23, 1 }
 0x2ef   :  { %v502_v26 = vadd.f32 %v501_v24, %v500_v22  ;;  %v4590_v22 = vld [vmem:[#allocation10 + $0x1cc] ss:$16 sps:$4 sm:$0xff]  }
 0x2f0   :  { %v508_v27 = vadd.f32 %v507_v25, %v506_v23  ;;  %v4592_v23 = vld [vmem:[#allocation10 + $0x1c8] ss:$16 sps:$4 sm:$0xff]   ;;  %v4593_v24 = vld [vmem:[#allocation10 + $0x1ec] ss:$16 sps:$4 sm:$0xff]  }
 0x2f1   :  { %v509_v28 = vmul.f32 0.125, %v502_v26  ;;  %v4595_v25 = vld [vmem:[#allocation10 + $0x1e8] ss:$16 sps:$4 sm:$0xff]  }
 0x2f2   :  { %v510_v29 = vmul.f32 0.125, %v508_v27 }
 0x2f3   :  { %v512_v30 = vadd.f32 1e-05, %v509_v28 }
 0x2f4   :  { %v513_v31 = vadd.f32 1e-05, %v510_v29 }
 0x2f5   :  { %4596 = vrsqrt.f32 %v512_v30 }
 0x2f6   :  { %4598 = vrsqrt.f32 %v513_v31 }
 0x2ff   :  { %v4597_v36 = vpop.eup %4596 }
 0x300   :  { %v4599_v38 = vpop.eup %4598 }
 0x301   :  { %v518_v39 = vcombine.low %v4597_v36, %v4599_v38 }
 0x303   :  { %v525_v40 = vrot.slane %v518_v39, %v5090_v37 }
 0x305   :  { %v532_v43 = vrot.slane %v525_v40, %v5090_v37 }
 0x307   :  { %v534_v45 = vmul.f32 %v532_v43, %v511_v41 }
 0x309   :  { %v539_v46 = vrot.slane %v534_v45, %v5097_v42  ;;  %v543_v47 = vrot.slane %v534_v45, %v5101_v12 }
 0x30b   :  { %v547_v50 = vmul.f32 %v543_v47, %v494_v13  ;;  %v546_v51 = vmul.f32 %v539_v46, %v493_v11  ;;  %v4575_v11 = vld [vmem:[#allocation10 + $0x12c] ss:$16 sps:$4 sm:$0xff]   ;;  %v4577_v13 = vld [vmem:[#allocation10 + $0x128] ss:$16 sps:$4 sm:$0xff]  }
 0x30d   :  { %v561_v52 = vadd.f32 %v557_v49, %v547_v50  ;;  %v560_v53 = vadd.f32 %v553_v48, %v546_v51 }
 0x30f   :  { %v563_v54 = vmul.f32 0.2, %v561_v52  ;;  %v562_v55 = vmul.f32 0.2, %v560_v53 }
 0x311   :  { %v565_v56 = vmax.f32 %v561_v52, %v563_v54  ;;  %v5107_v58 = vmax.f32 %v560_v53, %v562_v55 }
 0x313   :  { %822 = vmatprep.mubr.f32.mxu1 %v565_v56 }
 0x314   :  { %823 = vmatmul.mubr.f32.vlgmr.msra.gmra.mrb[2].mxu1 %v5107_v58 }
 0x315   :  { %3539 = vmatpush1.bf16.msra.mxu1 %v4550_v57  ;;  %893 = vmatprep.mubr.f32.mxu1 %v565_v56 }
 0x316   :  { %3541 = vmatprep.subr.bf16.mxu1 %v4551_v59 }
 0x319   :  { %3543 = vmatpush1.bf16.msra.mxu1 %v4553_v60 }
 0x31a   :  { %3545 = vmatprep.subr.bf16.mxu1 %v4554_v61 }
 0x31d   :  { %3547 = vmatpush1.bf16.msra.mxu1 %v4556_v62 }
 0x31e   :  { %3549 = vmatprep.subr.bf16.mxu1 %v4557_v63 }
 0x321   :  { %3551 = vmatpush1.bf16.msra.mxu1 %v4559_v0 }
 0x322   :  { %3553 = vmatprep.subr.bf16.mxu1 %v4560_v1 }
 0x325   :  { %3555 = vmatpush1.bf16.msra.mxu1 %v4562_v2 }
 0x326   :  { %3557 = vmatprep.subr.bf16.mxu1 %v4563_v3 }
 0x329   :  { %3559 = vmatpush1.bf16.msra.mxu1 %v4565_v4 }
 0x32a   :  { %3561 = vmatprep.subr.bf16.mxu1 %v4566_v5 }
 0x32d   :  { %3563 = vmatpush1.bf16.msra.mxu1 %v4568_v6 }
 0x32e   :  { %3565 = vmatprep.subr.bf16.mxu1 %v4569_v7 }
 0x331   :  { %3567 = vmatpush1.bf16.msra.mxu1 %v4571_v8 }
 0x332   :  { %3569 = vmatprep.subr.bf16.mxu1 %v4572_v9 }
 0x335   :  { %3571 = vmatpush1.bf16.msra.mxu1 %v4574_v10 }
 0x336   :  { %3573 = vmatprep.subr.bf16.mxu1 %v4575_v11 }
 0x339   :  { %3575 = vmatpush1.bf16.msra.mxu1 %v4577_v13 }
 0x33a   :  { %3577 = vmatprep.subr.bf16.mxu1 %v4578_v14 }
 0x33d   :  { %3579 = vmatpush1.bf16.msra.mxu1 %v4580_v15 }
 0x33e   :  { %3581 = vmatprep.subr.bf16.mxu1 %v4581_v16 }
 0x341   :  { %3583 = vmatpush1.bf16.msra.mxu1 %v4583_v17 }
 0x342   :  { %3585 = vmatprep.subr.bf16.mxu1 %v4584_v18 }
 0x345   :  { %3587 = vmatpush1.bf16.msra.mxu1 %v4586_v19 }
 0x346   :  { %3589 = vmatprep.subr.bf16.mxu1 %v4587_v20 }
 0x349   :  { %3591 = vmatpush1.bf16.msra.mxu1 %v4589_v21 }
 0x34a   :  { %3593 = vmatprep.subr.bf16.mxu1 %v4590_v22 }
 0x34d   :  { %3595 = vmatpush1.bf16.msra.mxu1 %v4592_v23 }
 0x34e   :  { %3597 = vmatprep.subr.bf16.mxu1 %v4593_v24 }
 0x351   :  { %3599 = vmatpush1.bf16.msra.mxu1 %v4595_v25 }
 0x354   :  { %894 = vmatmul.mubr.f32.vlgmr.msra.gmra.mrb[4].mxu1 %v5107_v58 }
 0x3e7   :  { %v824_v26 = vpop.f32.mrb[2].mxu1 }
 0x3e8   :  { %v900_v27 = vrot.slane %v824_v26, 4  ;;  %v826_v28 = vpop.f32.mrb[3].mxu1 }
 0x3e9   :  { %v906_v29 = vrot.slane %v826_v28, 4 }
 0x3ea   :  { %v901_v30 = vadd.f32 %v900_v27, %v824_v26 }
 0x3eb   :  { %v907_v31 = vadd.f32 %v906_v29, %v826_v28 }
 0x3ec   :  { %v902_v32 = vrot.slane %v901_v30, 2 }
 0x3ed   :  { %v908_v33 = vrot.slane %v907_v31, 2 }
 0x3ee   :  { %v903_v34 = vadd.f32 %v902_v32, %v901_v30 }
 0x3ef   :  { %v909_v36 = vadd.f32 %v908_v33, %v907_v31 }
 0x3f0   :  { %v904_v38 = vrot.slane %v903_v34, 1 }
 0x3f1   :  { %v910_v39 = vrot.slane %v909_v36, 1 }
 0x3f2   :  { %v905_v40 = vadd.f32 %v904_v38, %v903_v34 }
 0x3f3   :  { %v911_v41 = vadd.f32 %v910_v39, %v909_v36 }
 0x3f4   :  { %v924_v43 = vmul.f32 0.125, %v905_v40 }
 0x3f5   :  { %v925_v44 = vmul.f32 0.125, %v911_v41 }
 0x3f6   :  { %v5111_v45 = vsub.f32 %v824_v26, %v924_v43 }
 0x3f7   :  { %v5113_v46 = vsub.f32 %v826_v28, %v925_v44 }
 0x3f8   :  { %v932_v47 = vmul.f32 %v5111_v45, %v5111_v45 }
 0x3f9   :  { %v933_v48 = vmul.f32 %v5113_v46, %v5113_v46 }
 0x3fa   :  { %v936_v49 = vrot.slane %v932_v47, 4 }
 0x3fb   :  { %v942_v50 = vrot.slane %v933_v48, 4 }
 0x3fc   :  { %v937_v51 = vadd.f32 %v936_v49, %v932_v47 }
 0x3fd   :  { %v943_v52 = vadd.f32 %v942_v50, %v933_v48 }
 0x3fe   :  { %v938_v53 = vrot.slane %v937_v51, 2 }
 0x3ff   :  { %v944_v54 = vrot.slane %v943_v52, 2 }
 0x400   :  { %v939_v55 = vadd.f32 %v938_v53, %v937_v51 }
 0x401   :  { %v945_v56 = vadd.f32 %v944_v54, %v943_v52  ;;  %v964_v52 = vld [vmem:[%s5308_s8] sm:$0xf]  ;;  %v5126_v54 = vsub.s32 2, %v5087_v35 }
 0x402   :  { %v940_v57 = vrot.slane %v939_v55, 1 }
 0x403   :  { %v946_v58 = vrot.slane %v945_v56, 1 }
 0x404   :  { %v941_v59 = vadd.f32 %v940_v57, %v939_v55  ;;  %v5129_v55 = vsub.s32 3, %v5087_v35 }
 0x405   :  { %v947_v60 = vadd.f32 %v946_v58, %v945_v56  ;;  %v1028_v56 = vld [vmem:[#allocation12] sm:$0xf] }
 0x406   :  { %v960_v61 = vmul.f32 0.125, %v941_v59  ;;  %v1033_v58 = vrot.slane %v1028_v56, %v5097_v42  ;;  %v1037_v59 = vrot.slane %v1028_v56, %v5101_v12 }
 0x407   :  { %v961_v62 = vmul.f32 0.125, %v947_v60  ;;  %v1041_v60 = vrot.slane %v1028_v56, %v5126_v54 }
 0x408   :  { %v965_v63 = vadd.f32 1e-05, %v960_v61  ;;  %v1045_v61 = vrot.slane %v1028_v56, %v5129_v55 }
 0x409   :  { %v966_v0 = vadd.f32 1e-05, %v961_v62 }
 0x40a   :  { %4600 = vrsqrt.f32 %v965_v63 }
 0x40b   :  { %4602 = vrsqrt.f32 %v966_v0 }
 0x414   :  { %v4601_v1 = vpop.eup %4600 }
 0x415   :  { %v4603_v2 = vpop.eup %4602 }
 0x416   :  { %v977_v3 = vcombine.low %v4601_v1, %v4603_v2 }
 0x418   :  { %v985_v49 = vrot.slane %v977_v3, %v5090_v37 }
 0x427   :  { %v895_v4 = vpop.f32.mrb[4].mxu1 }
 0x428   :  { %v912_v5 = vrot.slane %v895_v4, 4  ;;  %v897_v6 = vpop.f32.mrb[5].mxu1 }
 0x429   :  { %v918_v7 = vrot.slane %v897_v6, 4 }
 0x42a   :  { %v913_v8 = vadd.f32 %v912_v5, %v895_v4 }
 0x42b   :  { %v919_v9 = vadd.f32 %v918_v7, %v897_v6 }
 0x42c   :  { %v914_v10 = vrot.slane %v913_v8, 2 }
 0x42d   :  { %v920_v11 = vrot.slane %v919_v9, 2 }
 0x42e   :  { %v915_v13 = vadd.f32 %v914_v10, %v913_v8 }
 0x42f   :  { %v921_v14 = vadd.f32 %v920_v11, %v919_v9 }
 0x430   :  { %v916_v15 = vrot.slane %v915_v13, 1 }
 0x431   :  { %v922_v16 = vrot.slane %v921_v14, 1 }
 0x432   :  { %v917_v17 = vadd.f32 %v916_v15, %v915_v13 }
 0x433   :  { %v923_v18 = vadd.f32 %v922_v16, %v921_v14 }
 0x434   :  { %v926_v19 = vmul.f32 0.125, %v917_v17 }
 0x435   :  { %v927_v20 = vmul.f32 0.125, %v923_v18 }
 0x436   :  { %v930_v21 = vsub.f32 %v895_v4, %v926_v19 }
 0x437   :  { %v931_v22 = vsub.f32 %v897_v6, %v927_v20 }
 0x438   :  { %v934_v23 = vmul.f32 %v930_v21, %v930_v21 }
 0x439   :  { %v935_v24 = vmul.f32 %v931_v22, %v931_v22 }
 0x43a   :  { %v948_v25 = vrot.slane %v934_v23, 4 }
 0x43b   :  { %v954_v26 = vrot.slane %v935_v24, 4 }
 0x43c   :  { %v949_v27 = vadd.f32 %v948_v25, %v934_v23 }
 0x43d   :  { %v955_v28 = vadd.f32 %v954_v26, %v935_v24 }
 0x43e   :  { %v950_v29 = vrot.slane %v949_v27, 2 }
 0x43f   :  { %v956_v30 = vrot.slane %v955_v28, 2 }
 0x440   :  { %v951_v31 = vadd.f32 %v950_v29, %v949_v27 }
 0x441   :  { %v957_v32 = vadd.f32 %v956_v30, %v955_v28 }
 0x442   :  { %v952_v33 = vrot.slane %v951_v31, 1 }
 0x443   :  { %v958_v34 = vrot.slane %v957_v32, 1 }
 0x444   :  { %v953_v36 = vadd.f32 %v952_v33, %v951_v31 }
 0x445   :  { %v959_v38 = vadd.f32 %v958_v34, %v957_v32 }
 0x446   :  { %v962_v39 = vmul.f32 0.125, %v953_v36 }
 0x447   :  { %v963_v40 = vmul.f32 0.125, %v959_v38 }
 0x448   :  { %v967_v41 = vadd.f32 1e-05, %v962_v39 }
 0x449   :  { %v968_v43 = vadd.f32 1e-05, %v963_v40 }
 0x44a   :  { %4604 = vrsqrt.f32 %v967_v41 }
 0x44b   :  { %4606 = vrsqrt.f32 %v968_v43 }
 0x454   :  { %v4605_v44 = vpop.eup %4604 }
 0x455   :  { %v4607_v47 = vpop.eup %4606 }
 0x456   :  { %v978_v48 = vcombine.low %v4605_v44, %v4607_v47 }
 0x458   :  { %v992_v50 = vrot.slane %v978_v48, %v5090_v37 }
 0x45a   :  { %v993_v51 = vcombine.low %v985_v49, %v992_v50 }
 0x45c   :  { %v1000_v53 = vrot.slane %v993_v51, %v5090_v37 }
 0x45e   :  { %v1002_v57 = vmul.f32 %v1000_v53, %v964_v52 }
 0x460   :  { %v1007_v62 = vrot.slane %v1002_v57, %v5097_v42  ;;  %v1011_v63 = vrot.slane %v1002_v57, %v5101_v12  ;;  %v1015_v0 = vrot.slane %v1002_v57, %v5126_v54  ;;  %v1019_v1 = vrot.slane %v1002_v57, %v5129_v55 }
 0x462   :  { %v1024_v2 = vmul.f32 %v1007_v62, %v5111_v45  ;;  %v1025_v3 = vmul.f32 %v1011_v63, %v5113_v46  ;;  %v1026_v4 = vmul.f32 %v1015_v0, %v930_v21  ;;  %v1027_v5 = vmul.f32 %v1019_v1, %v931_v22 }
 0x464   :  { %v1050_v6 = vadd.f32 %v1033_v58, %v1024_v2  ;;  %v1051_v7 = vadd.f32 %v1037_v59, %v1025_v3  ;;  %v1052_v8 = vadd.f32 %v1041_v60, %v1026_v4  ;;  %v1053_v9 = vadd.f32 %v1045_v61, %v1027_v5 }
 0x466   :  { %v1054_v10 = vmul.f32 0.2, %v1050_v6  ;;  %v1055_v11 = vmul.f32 0.2, %v1051_v7  ;;  %v1056_v13 = vmul.f32 0.2, %v1052_v8 }
 0x467   :  { %v1057_v14 = vmul.f32 0.2, %v1053_v9 }
 0x468   :  { %v5141_v15 = vmax.f32 %v1050_v6, %v1054_v10  ;;  %v5143_v16 = vmax.f32 %v1051_v7, %v1055_v11  ;;  %v5145_v17 = vmax.f32 %v1052_v8, %v1056_v13 }
 0x469   :  { %v5147_v18 = vmax.f32 %v1053_v9, %v1057_v14 }
 0x46a   :  { %4814 = dma.done.wait [#allocation4], 32768 }
 0x46b   :  { %4815 = vsyncadd [#allocation4], 4294934528  ;;  %1898 = vmatprep.mubr.f32.mxu1 %v5143_v16  ;;  %1969 = vmatprep.mubr.f32.mxu0 %v5147_v18  ;;  %v1067_v45 = vld [vmem:[#allocation2 + $0x8] sm:$0xff]  ;;  %v1066_v19 = vld [vmem:[#allocation2] sm:$0xff] }
 0x46c   :  { %v1195_v46 = vld [vmem:[#allocation2 + $0x408] sm:$0xff]  ;;  %3601 = vmatprep.subr.bf16.mxu1 %v1067_v45  ;;  %v1194_v20 = vld [vmem:[#allocation2 + $0x400] sm:$0xff] }
 0x46d   :  { %3665 = vmatprep.subr.bf16.mxu0 %v1195_v46  ;;  %v1075_v21 = vld [vmem:[#allocation2 + $0x48] sm:$0xff]  ;;  %3603 = vmatpush1.bf16.msra.mxu1 %v1066_v19  ;;  %v1074_v23 = vld [vmem:[#allocation2 + $0x40] sm:$0xff] }
 0x46e   :  { %v1203_v22 = vld [vmem:[#allocation2 + $0x448] sm:$0xff]  ;;  %3667 = vmatpush1.bf16.msra.mxu0 %v1194_v20  ;;  %3605 = vmatprep.subr.bf16.mxu1 %v1075_v21  ;;  %v1202_v24 = vld [vmem:[#allocation2 + $0x440] sm:$0xff] }
 0x46f   :  { %3669 = vmatprep.subr.bf16.mxu0 %v1203_v22  ;;  %v1083_v25 = vld [vmem:[#allocation2 + $0x88] sm:$0xff]  ;;  %v1082_v27 = vld [vmem:[#allocation2 + $0x80] sm:$0xff] }
 0x470   :  { %v1211_v26 = vld [vmem:[#allocation2 + $0x488] sm:$0xff]  ;;  %v1210_v28 = vld [vmem:[#allocation2 + $0x480] sm:$0xff] }
 0x471   :  { %3607 = vmatpush1.bf16.msra.mxu1 %v1074_v23  ;;  %v1091_v29 = vld [vmem:[#allocation2 + $0xc8] sm:$0xff]  ;;  %v1090_v31 = vld [vmem:[#allocation2 + $0xc0] sm:$0xff] }
 0x472   :  { %3671 = vmatpush1.bf16.msra.mxu0 %v1202_v24  ;;  %3609 = vmatprep.subr.bf16.mxu1 %v1083_v25  ;;  %v1219_v30 = vld [vmem:[#allocation2 + $0x4c8] sm:$0xff]  ;;  %v1218_v32 = vld [vmem:[#allocation2 + $0x4c0] sm:$0xff] }
 0x473   :  { %3673 = vmatprep.subr.bf16.mxu0 %v1211_v26  ;;  %v1099_v33 = vld [vmem:[#allocation2 + $0x108] sm:$0xff]  ;;  %v1098_v36 = vld [vmem:[#allocation2 + $0x100] sm:$0xff] }
 0x474   :  { %v1227_v34 = vld [vmem:[#allocation2 + $0x508] sm:$0xff]  ;;  %v1226_v38 = vld [vmem:[#allocation2 + $0x500] sm:$0xff] }
 0x475   :  { %3611 = vmatpush1.bf16.msra.mxu1 %v1082_v27  ;;  %v1107_v39 = vld [vmem:[#allocation2 + $0x148] sm:$0xff]  ;;  %v1106_v41 = vld [vmem:[#allocation2 + $0x140] sm:$0xff]  ;;  %v1069_v27 = vld [vmem:[#allocation2 + $0x18] sm:$0xff] }
 0x476   :  { %3675 = vmatpush1.bf16.msra.mxu0 %v1210_v28  ;;  %3613 = vmatprep.subr.bf16.mxu1 %v1091_v29  ;;  %v1235_v40 = vld [vmem:[#allocation2 + $0x548] sm:$0xff]  ;;  %v1234_v43 = vld [vmem:[#allocation2 + $0x540] sm:$0xff]  ;;  %v1068_v29 = vld [vmem:[#allocation2 + $0x10] sm:$0xff] }
 0x477   :  { %3677 = vmatprep.subr.bf16.mxu0 %v1219_v30  ;;  %v1115_v44 = vld [vmem:[#allocation2 + $0x188] sm:$0xff]  ;;  %v1114_v48 = vld [vmem:[#allocation2 + $0x180] sm:$0xff] }
 0x478   :  { %v1243_v47 = vld [vmem:[#allocation2 + $0x588] sm:$0xff]  ;;  %v1242_v49 = vld [vmem:[#allocation2 + $0x580] sm:$0xff] }
 0x479   :  { %3615 = vmatpush1.bf16.msra.mxu1 %v1090_v31  ;;  %v1123_v50 = vld [vmem:[#allocation2 + $0x1c8] sm:$0xff]  ;;  %v1122_v52 = vld [vmem:[#allocation2 + $0x1c0] sm:$0xff]  ;;  %v1077_v31 = vld [vmem:[#allocation2 + $0x58] sm:$0xff] }
 0x47a   :  { %3679 = vmatpush1.bf16.msra.mxu0 %v1218_v32  ;;  %3617 = vmatprep.subr.bf16.mxu1 %v1099_v33  ;;  %v1251_v51 = vld [vmem:[#allocation2 + $0x5c8] sm:$0xff]  ;;  %v1250_v53 = vld [vmem:[#allocation2 + $0x5c0] sm:$0xff]  ;;  %v1076_v33 = vld [vmem:[#allocation2 + $0x50] sm:$0xff] }
 0x47b   :  { %3681 = vmatprep.subr.bf16.mxu0 %v1227_v34  ;;  %v1131_v56 = vld [vmem:[#allocation2 + $0x208] sm:$0xff]  ;;  %v1130_v58 = vld [vmem:[#allocation2 + $0x200] sm:$0xff] }
 0x47c   :  { %v1259_v57 = vld [vmem:[#allocation2 + $0x608] sm:$0xff]  ;;  %v1258_v59 = vld [vmem:[#allocation2 + $0x600] sm:$0xff] }
 0x47d   :  { %3619 = vmatpush1.bf16.msra.mxu1 %v1098_v36  ;;  %v1139_v60 = vld [vmem:[#allocation2 + $0x248] sm:$0xff]  ;;  %v1138_v62 = vld [vmem:[#allocation2 + $0x240] sm:$0xff]  ;;  %v1085_v36 = vld [vmem:[#allocation2 + $0x98] sm:$0xff] }
 0x47e   :  { %3683 = vmatpush1.bf16.msra.mxu0 %v1226_v38  ;;  %3621 = vmatprep.subr.bf16.mxu1 %v1107_v39  ;;  %v1267_v61 = vld [vmem:[#allocation2 + $0x648] sm:$0xff]  ;;  %v1266_v63 = vld [vmem:[#allocation2 + $0x640] sm:$0xff]  ;;  %v1084_v39 = vld [vmem:[#allocation2 + $0x90] sm:$0xff] }
 0x47f   :  { %3685 = vmatprep.subr.bf16.mxu0 %v1235_v40  ;;  %v1147_v0 = vld [vmem:[#allocation2 + $0x288] sm:$0xff]  ;;  %v1146_v2 = vld [vmem:[#allocation2 + $0x280] sm:$0xff] }
 0x480   :  { %v1275_v1 = vld [vmem:[#allocation2 + $0x688] sm:$0xff]  ;;  %v1274_v3 = vld [vmem:[#allocation2 + $0x680] sm:$0xff] }
 0x481   :  { %3623 = vmatpush1.bf16.msra.mxu1 %v1106_v41  ;;  %v1155_v4 = vld [vmem:[#allocation2 + $0x2c8] sm:$0xff]  ;;  %v1154_v6 = vld [vmem:[#allocation2 + $0x2c0] sm:$0xff]  ;;  %v1093_v41 = vld [vmem:[#allocation2 + $0xd8] sm:$0xff] }
 0x482   :  { %3687 = vmatpush1.bf16.msra.mxu0 %v1234_v43  ;;  %3625 = vmatprep.subr.bf16.mxu1 %v1115_v44  ;;  %v1283_v5 = vld [vmem:[#allocation2 + $0x6c8] sm:$0xff]  ;;  %v1282_v7 = vld [vmem:[#allocation2 + $0x6c0] sm:$0xff]  ;;  %v1092_v44 = vld [vmem:[#allocation2 + $0xd0] sm:$0xff] }
 0x483   :  { %3689 = vmatprep.subr.bf16.mxu0 %v1243_v47  ;;  %v1163_v8 = vld [vmem:[#allocation2 + $0x308] sm:$0xff]  ;;  %v1162_v10 = vld [vmem:[#allocation2 + $0x300] sm:$0xff] }
 0x484   :  { %v1291_v9 = vld [vmem:[#allocation2 + $0x708] sm:$0xff]  ;;  %v1290_v11 = vld [vmem:[#allocation2 + $0x700] sm:$0xff] }
 0x485   :  { %3627 = vmatpush1.bf16.msra.mxu1 %v1114_v48  ;;  %v1171_v13 = vld [vmem:[#allocation2 + $0x348] sm:$0xff]  ;;  %v1170_v45 = vld [vmem:[#allocation2 + $0x340] sm:$0xff]  ;;  %v1101_v48 = vld [vmem:[#allocation2 + $0x118] sm:$0xff] }
 0x486   :  { %3691 = vmatpush1.bf16.msra.mxu0 %v1242_v49  ;;  %3629 = vmatprep.subr.bf16.mxu1 %v1123_v50  ;;  %v1299_v14 = vld [vmem:[#allocation2 + $0x748] sm:$0xff]  ;;  %v1298_v46 = vld [vmem:[#allocation2 + $0x740] sm:$0xff]  ;;  %v1100_v50 = vld [vmem:[#allocation2 + $0x110] sm:$0xff] }
 0x487   :  { %3693 = vmatprep.subr.bf16.mxu0 %v1251_v51  ;;  %v1179_v19 = vld [vmem:[#allocation2 + $0x388] sm:$0xff]  ;;  %v1178_v21 = vld [vmem:[#allocation2 + $0x380] sm:$0xff] }
 0x488   :  { %v1307_v20 = vld [vmem:[#allocation2 + $0x788] sm:$0xff]  ;;  %v1306_v22 = vld [vmem:[#allocation2 + $0x780] sm:$0xff] }
 0x489   :  { %3631 = vmatpush1.bf16.msra.mxu1 %v1122_v52  ;;  %v1187_v23 = vld [vmem:[#allocation2 + $0x3c8] sm:$0xff]  ;;  %v1186_v25 = vld [vmem:[#allocation2 + $0x3c0] sm:$0xff]  ;;  %v1109_v52 = vld [vmem:[#allocation2 + $0x158] sm:$0xff] }
 0x48a   :  { %3695 = vmatpush1.bf16.msra.mxu0 %v1250_v53  ;;  %3633 = vmatprep.subr.bf16.mxu1 %v1131_v56  ;;  %v1315_v24 = vld [vmem:[#allocation2 + $0x7c8] sm:$0xff]  ;;  %v1314_v26 = vld [vmem:[#allocation2 + $0x7c0] sm:$0xff]  ;;  %v1108_v56 = vld [vmem:[#allocation2 + $0x150] sm:$0xff] }
 0x48b   :  { %3697 = vmatprep.subr.bf16.mxu0 %v1259_v57  ;;  %v1071_v28 = vld [vmem:[#allocation2 + $0x28] sm:$0xff]  ;;  %v1070_v30 = vld [vmem:[#allocation2 + $0x20] sm:$0xff] }
 0x48c   :  { %v1079_v32 = vld [vmem:[#allocation2 + $0x68] sm:$0xff]  ;;  %v1078_v34 = vld [vmem:[#allocation2 + $0x60] sm:$0xff] }
 0x48d   :  { %3635 = vmatpush1.bf16.msra.mxu1 %v1130_v58  ;;  %v1087_v38 = vld [vmem:[#allocation2 + $0xa8] sm:$0xff]  ;;  %v1086_v40 = vld [vmem:[#allocation2 + $0xa0] sm:$0xff]  ;;  %v1117_v58 = vld [vmem:[#allocation2 + $0x198] sm:$0xff] }
 0x48e   :  { %3699 = vmatpush1.bf16.msra.mxu0 %v1258_v59  ;;  %3637 = vmatprep.subr.bf16.mxu1 %v1139_v60  ;;  %v1095_v43 = vld [vmem:[#allocation2 + $0xe8] sm:$0xff]  ;;  %v1094_v47 = vld [vmem:[#allocation2 + $0xe0] sm:$0xff]  ;;  %v1116_v60 = vld [vmem:[#allocation2 + $0x190] sm:$0xff] }
 0x48f   :  { %3701 = vmatprep.subr.bf16.mxu0 %v1267_v61  ;;  %v1103_v49 = vld [vmem:[#allocation2 + $0x128] sm:$0xff]  ;;  %v1102_v51 = vld [vmem:[#allocation2 + $0x120] sm:$0xff] }
 0x490   :  { %v1111_v53 = vld [vmem:[#allocation2 + $0x168] sm:$0xff]  ;;  %v1110_v57 = vld [vmem:[#allocation2 + $0x160] sm:$0xff] }
 0x491   :  { %3639 = vmatpush1.bf16.msra.mxu1 %v1138_v62  ;;  %v1119_v59 = vld [vmem:[#allocation2 + $0x1a8] sm:$0xff]  ;;  %v1118_v61 = vld [vmem:[#allocation2 + $0x1a0] sm:$0xff]  ;;  %v1125_v62 = vld [vmem:[#allocation2 + $0x1d8] sm:$0xff] }
 0x492   :  { %3703 = vmatpush1.bf16.msra.mxu0 %v1266_v63  ;;  %3641 = vmatprep.subr.bf16.mxu1 %v1147_v0  ;;  %v1127_v63 = vld [vmem:[#allocation2 + $0x1e8] sm:$0xff]  ;;  %v1124_v0 = vld [vmem:[#allocation2 + $0x1d0] sm:$0xff] }
 0x493   :  { %3705 = vmatprep.subr.bf16.mxu0 %v1275_v1  ;;  %v1126_v1 = vld [vmem:[#allocation2 + $0x1e0] sm:$0xff] }
 0x495   :  { %3643 = vmatpush1.bf16.msra.mxu1 %v1146_v2  ;;  %v1133_v2 = vld [vmem:[#allocation2 + $0x218] sm:$0xff] }
 0x496   :  { %3707 = vmatpush1.bf16.msra.mxu0 %v1274_v3  ;;  %3645 = vmatprep.subr.bf16.mxu1 %v1155_v4  ;;  %v1135_v3 = vld [vmem:[#allocation2 + $0x228] sm:$0xff]  ;;  %v1132_v4 = vld [vmem:[#allocation2 + $0x210] sm:$0xff] }
 0x497   :  { %3709 = vmatprep.subr.bf16.mxu0 %v1283_v5  ;;  %v1134_v5 = vld [vmem:[#allocation2 + $0x220] sm:$0xff] }
 0x499   :  { %3647 = vmatpush1.bf16.msra.mxu1 %v1154_v6  ;;  %v1141_v6 = vld [vmem:[#allocation2 + $0x258] sm:$0xff] }
 0x49a   :  { %3711 = vmatpush1.bf16.msra.mxu0 %v1282_v7  ;;  %3649 = vmatprep.subr.bf16.mxu1 %v1163_v8  ;;  %v1143_v7 = vld [vmem:[#allocation2 + $0x268] sm:$0xff]  ;;  %v1140_v8 = vld [vmem:[#allocation2 + $0x250] sm:$0xff] }
 0x49b   :  { %3713 = vmatprep.subr.bf16.mxu0 %v1291_v9  ;;  %v1142_v9 = vld [vmem:[#allocation2 + $0x260] sm:$0xff] }
 0x49d   :  { %3651 = vmatpush1.bf16.msra.mxu1 %v1162_v10  ;;  %v1149_v10 = vld [vmem:[#allocation2 + $0x298] sm:$0xff] }
 0x49e   :  { %3715 = vmatpush1.bf16.msra.mxu0 %v1290_v11  ;;  %3653 = vmatprep.subr.bf16.mxu1 %v1171_v13  ;;  %v1151_v11 = vld [vmem:[#allocation2 + $0x2a8] sm:$0xff]  ;;  %v1148_v13 = vld [vmem:[#allocation2 + $0x290] sm:$0xff] }
 0x49f   :  { %3717 = vmatprep.subr.bf16.mxu0 %v1299_v14  ;;  %v1150_v14 = vld [vmem:[#allocation2 + $0x2a0] sm:$0xff] }
 0x4a1   :  { %3655 = vmatpush1.bf16.msra.mxu1 %v1170_v45  ;;  %v1157_v45 = vld [vmem:[#allocation2 + $0x2d8] sm:$0xff] }
 0x4a2   :  { %3719 = vmatpush1.bf16.msra.mxu0 %v1298_v46  ;;  %3657 = vmatprep.subr.bf16.mxu1 %v1179_v19  ;;  %v1159_v46 = vld [vmem:[#allocation2 + $0x2e8] sm:$0xff]  ;;  %v1156_v19 = vld [vmem:[#allocation2 + $0x2d0] sm:$0xff] }
 0x4a3   :  { %3721 = vmatprep.subr.bf16.mxu0 %v1307_v20  ;;  %v1158_v20 = vld [vmem:[#allocation2 + $0x2e0] sm:$0xff] }
 0x4a5   :  { %3659 = vmatpush1.bf16.msra.mxu1 %v1178_v21  ;;  %v1165_v21 = vld [vmem:[#allocation2 + $0x318] sm:$0xff] }
 0x4a6   :  { %3723 = vmatpush1.bf16.msra.mxu0 %v1306_v22  ;;  %3661 = vmatprep.subr.bf16.mxu1 %v1187_v23  ;;  %v1167_v22 = vld [vmem:[#allocation2 + $0x328] sm:$0xff]  ;;  %v1164_v23 = vld [vmem:[#allocation2 + $0x310] sm:$0xff] }
 0x4a7   :  { %3725 = vmatprep.subr.bf16.mxu0 %v1315_v24  ;;  %v1166_v24 = vld [vmem:[#allocation2 + $0x320] sm:$0xff] }
 0x4a9   :  { %3663 = vmatpush1.bf16.msra.mxu1 %v1186_v25  ;;  %v1173_v25 = vld [vmem:[#allocation2 + $0x358] sm:$0xff] }
 0x4aa   :  { %3727 = vmatpush1.bf16.msra.mxu0 %v1314_v26  ;;  %3729 = vmatprep.subr.bf16.mxu1 %v1069_v27  ;;  %v1175_v26 = vld [vmem:[#allocation2 + $0x368] sm:$0xff]  ;;  %v1172_v27 = vld [vmem:[#allocation2 + $0x350] sm:$0xff] }
 0x4ab   :  { %3857 = vmatprep.subr.bf16.mxu0 %v1071_v28  ;;  %v1174_v28 = vld [vmem:[#allocation2 + $0x360] sm:$0xff] }
 0x4ac   :  { %1899 = vmatmul.mubr.f32.vlgmr.msra.gmra.mrb[6].mxu1 %v5141_v15 }
 0x4ad   :  { %1970 = vmatmul.mubr.f32.vlgmr.msra.gmra.mrb[4].mxu0 %v5145_v17  ;;  %3731 = vmatpush1.bf16.msra.mxu1 %v1068_v29  ;;  %v1181_v29 = vld [vmem:[#allocation2 + $0x398] sm:$0xff] }
 0x4ae   :  { %3859 = vmatpush1.bf16.msra.mxu0 %v1070_v30  ;;  %3733 = vmatprep.subr.bf16.mxu1 %v1077_v31  ;;  %v1183_v30 = vld [vmem:[#allocation2 + $0x3a8] sm:$0xff]  ;;  %v1180_v31 = vld [vmem:[#allocation2 + $0x390] sm:$0xff] }
 0x4af   :  { %3861 = vmatprep.subr.bf16.mxu0 %v1079_v32  ;;  %2040 = vmatprep.mubr.f32.mxu1 %v5143_v16  ;;  %v1182_v32 = vld [vmem:[#allocation2 + $0x3a0] sm:$0xff] }
 0x4b0   :  { %2182 = vmatprep.mubr.f32.mxu0 %v5143_v16 }
 0x4b1   :  { %3735 = vmatpush1.bf16.msra.mxu1 %v1076_v33  ;;  %v1189_v33 = vld [vmem:[#allocation2 + $0x3d8] sm:$0xff] }
 0x4b2   :  { %3863 = vmatpush1.bf16.msra.mxu0 %v1078_v34  ;;  %3737 = vmatprep.subr.bf16.mxu1 %v1085_v36  ;;  %v1191_v34 = vld [vmem:[#allocation2 + $0x3e8] sm:$0xff]  ;;  %v1188_v36 = vld [vmem:[#allocation2 + $0x3d0] sm:$0xff] }
 0x4b3   :  { %3865 = vmatprep.subr.bf16.mxu0 %v1087_v38  ;;  %v1190_v38 = vld [vmem:[#allocation2 + $0x3e0] sm:$0xff] }
 0x4b5   :  { %3739 = vmatpush1.bf16.msra.mxu1 %v1084_v39  ;;  %v1197_v39 = vld [vmem:[#allocation2 + $0x418] sm:$0xff] }
 0x4b6   :  { %3867 = vmatpush1.bf16.msra.mxu0 %v1086_v40  ;;  %3741 = vmatprep.subr.bf16.mxu1 %v1093_v41  ;;  %v1199_v40 = vld [vmem:[#allocation2 + $0x428] sm:$0xff]  ;;  %v1196_v41 = vld [vmem:[#allocation2 + $0x410] sm:$0xff] }
 0x4b7   :  { %3869 = vmatprep.subr.bf16.mxu0 %v1095_v43  ;;  %v1198_v43 = vld [vmem:[#allocation2 + $0x420] sm:$0xff] }
 0x4b9   :  { %3743 = vmatpush1.bf16.msra.mxu1 %v1092_v44  ;;  %v1205_v44 = vld [vmem:[#allocation2 + $0x458] sm:$0xff] }
 0x4ba   :  { %3871 = vmatpush1.bf16.msra.mxu0 %v1094_v47  ;;  %3745 = vmatprep.subr.bf16.mxu1 %v1101_v48  ;;  %v1207_v47 = vld [vmem:[#allocation2 + $0x468] sm:$0xff]  ;;  %v1204_v48 = vld [vmem:[#allocation2 + $0x450] sm:$0xff] }
 0x4bb   :  { %3873 = vmatprep.subr.bf16.mxu0 %v1103_v49  ;;  %v1206_v49 = vld [vmem:[#allocation2 + $0x460] sm:$0xff] }
 0x4bd   :  { %3747 = vmatpush1.bf16.msra.mxu1 %v1100_v50  ;;  %v1213_v50 = vld [vmem:[#allocation2 + $0x498] sm:$0xff] }
 0x4be   :  { %3875 = vmatpush1.bf16.msra.mxu0 %v1102_v51  ;;  %3749 = vmatprep.subr.bf16.mxu1 %v1109_v52  ;;  %v1215_v51 = vld [vmem:[#allocation2 + $0x4a8] sm:$0xff]  ;;  %v1212_v52 = vld [vmem:[#allocation2 + $0x490] sm:$0xff] }
 0x4bf   :  { %3877 = vmatprep.subr.bf16.mxu0 %v1111_v53  ;;  %v1214_v53 = vld [vmem:[#allocation2 + $0x4a0] sm:$0xff] }
 0x4c1   :  { %3751 = vmatpush1.bf16.msra.mxu1 %v1108_v56  ;;  %v1221_v56 = vld [vmem:[#allocation2 + $0x4d8] sm:$0xff] }
 0x4c2   :  { %3879 = vmatpush1.bf16.msra.mxu0 %v1110_v57  ;;  %3753 = vmatprep.subr.bf16.mxu1 %v1117_v58  ;;  %v1223_v57 = vld [vmem:[#allocation2 + $0x4e8] sm:$0xff]  ;;  %v1220_v58 = vld [vmem:[#allocation2 + $0x4d0] sm:$0xff] }
 0x4c3   :  { %3881 = vmatprep.subr.bf16.mxu0 %v1119_v59  ;;  %v1222_v59 = vld [vmem:[#allocation2 + $0x4e0] sm:$0xff] }
 0x4c5   :  { %3755 = vmatpush1.bf16.msra.mxu1 %v1116_v60  ;;  %v1229_v60 = vld [vmem:[#allocation2 + $0x518] sm:$0xff] }
 0x4c6   :  { %3883 = vmatpush1.bf16.msra.mxu0 %v1118_v61  ;;  %3757 = vmatprep.subr.bf16.mxu1 %v1125_v62  ;;  %v1231_v61 = vld [vmem:[#allocation2 + $0x528] sm:$0xff]  ;;  %v1228_v62 = vld [vmem:[#allocation2 + $0x510] sm:$0xff] }
 0x4c7   :  { %3885 = vmatprep.subr.bf16.mxu0 %v1127_v63  ;;  %v1230_v63 = vld [vmem:[#allocation2 + $0x520] sm:$0xff] }
 0x4c9   :  { %3759 = vmatpush1.bf16.msra.mxu1 %v1124_v0  ;;  %v1237_v0 = vld [vmem:[#allocation2 + $0x558] sm:$0xff] }
 0x4ca   :  { %3887 = vmatpush1.bf16.msra.mxu0 %v1126_v1  ;;  %3761 = vmatprep.subr.bf16.mxu1 %v1133_v2  ;;  %v1239_v1 = vld [vmem:[#allocation2 + $0x568] sm:$0xff]  ;;  %v1236_v2 = vld [vmem:[#allocation2 + $0x550] sm:$0xff] }
 0x4cb   :  { %3889 = vmatprep.subr.bf16.mxu0 %v1135_v3  ;;  %v1238_v3 = vld [vmem:[#allocation2 + $0x560] sm:$0xff] }
 0x4cd   :  { %3763 = vmatpush1.bf16.msra.mxu1 %v1132_v4  ;;  %v1245_v4 = vld [vmem:[#allocation2 + $0x598] sm:$0xff] }
 0x4ce   :  { %3891 = vmatpush1.bf16.msra.mxu0 %v1134_v5  ;;  %3765 = vmatprep.subr.bf16.mxu1 %v1141_v6  ;;  %v1247_v5 = vld [vmem:[#allocation2 + $0x5a8] sm:$0xff]  ;;  %v1244_v6 = vld [vmem:[#allocation2 + $0x590] sm:$0xff] }
 0x4cf   :  { %3893 = vmatprep.subr.bf16.mxu0 %v1143_v7  ;;  %v1246_v7 = vld [vmem:[#allocation2 + $0x5a0] sm:$0xff] }
 0x4d1   :  { %3767 = vmatpush1.bf16.msra.mxu1 %v1140_v8  ;;  %v1253_v8 = vld [vmem:[#allocation2 + $0x5d8] sm:$0xff] }
 0x4d2   :  { %3895 = vmatpush1.bf16.msra.mxu0 %v1142_v9  ;;  %3769 = vmatprep.subr.bf16.mxu1 %v1149_v10  ;;  %v1255_v9 = vld [vmem:[#allocation2 + $0x5e8] sm:$0xff]  ;;  %v1252_v10 = vld [vmem:[#allocation2 + $0x5d0] sm:$0xff] }
 0x4d3   :  { %3897 = vmatprep.subr.bf16.mxu0 %v1151_v11  ;;  %v1254_v11 = vld [vmem:[#allocation2 + $0x5e0] sm:$0xff] }
 0x4d5   :  { %3771 = vmatpush1.bf16.msra.mxu1 %v1148_v13  ;;  %v1261_v13 = vld [vmem:[#allocation2 + $0x618] sm:$0xff] }
 0x4d6   :  { %3899 = vmatpush1.bf16.msra.mxu0 %v1150_v14  ;;  %3773 = vmatprep.subr.bf16.mxu1 %v1157_v45  ;;  %v1263_v14 = vld [vmem:[#allocation2 + $0x628] sm:$0xff]  ;;  %v1260_v45 = vld [vmem:[#allocation2 + $0x610] sm:$0xff] }
 0x4d7   :  { %3901 = vmatprep.subr.bf16.mxu0 %v1159_v46  ;;  %v1262_v46 = vld [vmem:[#allocation2 + $0x620] sm:$0xff] }
 0x4d9   :  { %3775 = vmatpush1.bf16.msra.mxu1 %v1156_v19  ;;  %v1269_v19 = vld [vmem:[#allocation2 + $0x658] sm:$0xff] }
 0x4da   :  { %3903 = vmatpush1.bf16.msra.mxu0 %v1158_v20  ;;  %3777 = vmatprep.subr.bf16.mxu1 %v1165_v21  ;;  %v1271_v20 = vld [vmem:[#allocation2 + $0x668] sm:$0xff]  ;;  %v1268_v21 = vld [vmem:[#allocation2 + $0x650] sm:$0xff] }
 0x4db   :  { %3905 = vmatprep.subr.bf16.mxu0 %v1167_v22  ;;  %v1270_v22 = vld [vmem:[#allocation2 + $0x660] sm:$0xff] }
 0x4dd   :  { %3779 = vmatpush1.bf16.msra.mxu1 %v1164_v23  ;;  %v1277_v23 = vld [vmem:[#allocation2 + $0x698] sm:$0xff] }
 0x4de   :  { %3907 = vmatpush1.bf16.msra.mxu0 %v1166_v24  ;;  %3781 = vmatprep.subr.bf16.mxu1 %v1173_v25  ;;  %v1279_v24 = vld [vmem:[#allocation2 + $0x6a8] sm:$0xff]  ;;  %v1276_v25 = vld [vmem:[#allocation2 + $0x690] sm:$0xff] }
 0x4df   :  { %3909 = vmatprep.subr.bf16.mxu0 %v1175_v26  ;;  %v1278_v26 = vld [vmem:[#allocation2 + $0x6a0] sm:$0xff] }
 0x4e1   :  { %3783 = vmatpush1.bf16.msra.mxu1 %v1172_v27  ;;  %v1285_v27 = vld [vmem:[#allocation2 + $0x6d8] sm:$0xff] }
 0x4e2   :  { %3911 = vmatpush1.bf16.msra.mxu0 %v1174_v28  ;;  %3785 = vmatprep.subr.bf16.mxu1 %v1181_v29  ;;  %v1287_v28 = vld [vmem:[#allocation2 + $0x6e8] sm:$0xff]  ;;  %v1284_v29 = vld [vmem:[#allocation2 + $0x6d0] sm:$0xff] }
 0x4e3   :  { %3913 = vmatprep.subr.bf16.mxu0 %v1183_v30  ;;  %v1286_v30 = vld [vmem:[#allocation2 + $0x6e0] sm:$0xff] }
 0x4e5   :  { %3787 = vmatpush1.bf16.msra.mxu1 %v1180_v31  ;;  %v1293_v31 = vld [vmem:[#allocation2 + $0x718] sm:$0xff] }
 0x4e6   :  { %3915 = vmatpush1.bf16.msra.mxu0 %v1182_v32  ;;  %3789 = vmatprep.subr.bf16.mxu1 %v1189_v33  ;;  %v1295_v32 = vld [vmem:[#allocation2 + $0x728] sm:$0xff]  ;;  %v1292_v33 = vld [vmem:[#allocation2 + $0x710] sm:$0xff] }
 0x4e7   :  { %3917 = vmatprep.subr.bf16.mxu0 %v1191_v34  ;;  %v1294_v34 = vld [vmem:[#allocation2 + $0x720] sm:$0xff] }
 0x4e9   :  { %3791 = vmatpush1.bf16.msra.mxu1 %v1188_v36  ;;  %v1301_v36 = vld [vmem:[#allocation2 + $0x758] sm:$0xff] }
 0x4ea   :  { %3919 = vmatpush1.bf16.msra.mxu0 %v1190_v38  ;;  %3793 = vmatprep.subr.bf16.mxu1 %v1197_v39  ;;  %v1303_v38 = vld [vmem:[#allocation2 + $0x768] sm:$0xff]  ;;  %v1300_v39 = vld [vmem:[#allocation2 + $0x750] sm:$0xff] }
 0x4eb   :  { %3921 = vmatprep.subr.bf16.mxu0 %v1199_v40  ;;  %v1302_v40 = vld [vmem:[#allocation2 + $0x760] sm:$0xff] }
 0x4ec   :  { %2041 = vmatmul.mubr.f32.vlgmr.msra.gmra.mrb[8].mxu1 %v5141_v15 }
 0x4ed   :  { %2183 = vmatmul.mubr.f32.vlgmr.msra.gmra.mrb[6].mxu0 %v5141_v15  ;;  %3795 = vmatpush1.bf16.msra.mxu1 %v1196_v41  ;;  %v1309_v41 = vld [vmem:[#allocation2 + $0x798] sm:$0xff] }
 0x4ee   :  { %3923 = vmatpush1.bf16.msra.mxu0 %v1198_v43  ;;  %3797 = vmatprep.subr.bf16.mxu1 %v1205_v44  ;;  %v1311_v43 = vld [vmem:[#allocation2 + $0x7a8] sm:$0xff]  ;;  %v1308_v44 = vld [vmem:[#allocation2 + $0x790] sm:$0xff] }
 0x4ef   :  { %3925 = vmatprep.subr.bf16.mxu0 %v1207_v47  ;;  %2111 = vmatprep.mubr.f32.mxu1 %v5147_v18  ;;  %v1310_v47 = vld [vmem:[#allocation2 + $0x7a0] sm:$0xff] }
 0x4f0   :  { %2253 = vmatprep.mubr.f32.mxu0 %v5147_v18 }
 0x4f1   :  { %3799 = vmatpush1.bf16.msra.mxu1 %v1204_v48  ;;  %v1317_v48 = vld [vmem:[#allocation2 + $0x7d8] sm:$0xff] }
 0x4f2   :  { %3927 = vmatpush1.bf16.msra.mxu0 %v1206_v49  ;;  %3801 = vmatprep.subr.bf16.mxu1 %v1213_v50  ;;  %v1319_v49 = vld [vmem:[#allocation2 + $0x7e8] sm:$0xff]  ;;  %v1316_v50 = vld [vmem:[#allocation2 + $0x7d0] sm:$0xff] }
 0x4f3   :  { %3929 = vmatprep.subr.bf16.mxu0 %v1215_v51  ;;  %v1318_v51 = vld [vmem:[#allocation2 + $0x7e0] sm:$0xff] }
 0x4f5   :  { %3803 = vmatpush1.bf16.msra.mxu1 %v1212_v52  ;;  %v1073_v52 = vld [vmem:[#allocation2 + $0x38] sm:$0xff] }
 0x4f6   :  { %3931 = vmatpush1.bf16.msra.mxu0 %v1214_v53  ;;  %3805 = vmatprep.subr.bf16.mxu1 %v1221_v56  ;;  %v1072_v53 = vld [vmem:[#allocation2 + $0x30] sm:$0xff]  ;;  %v1081_v56 = vld [vmem:[#allocation2 + $0x78] sm:$0xff] }
 0x4f7   :  { %3933 = vmatprep.subr.bf16.mxu0 %v1223_v57  ;;  %v1080_v57 = vld [vmem:[#allocation2 + $0x70] sm:$0xff] }
 0x4f9   :  { %3807 = vmatpush1.bf16.msra.mxu1 %v1220_v58  ;;  %v1089_v58 = vld [vmem:[#allocation2 + $0xb8] sm:$0xff] }
 0x4fa   :  { %3935 = vmatpush1.bf16.msra.mxu0 %v1222_v59  ;;  %3809 = vmatprep.subr.bf16.mxu1 %v1229_v60  ;;  %v1088_v59 = vld [vmem:[#allocation2 + $0xb0] sm:$0xff]  ;;  %v1097_v60 = vld [vmem:[#allocation2 + $0xf8] sm:$0xff] }
 0x4fb   :  { %3937 = vmatprep.subr.bf16.mxu0 %v1231_v61  ;;  %v1096_v61 = vld [vmem:[#allocation2 + $0xf0] sm:$0xff] }
 0x4fd   :  { %3811 = vmatpush1.bf16.msra.mxu1 %v1228_v62  ;;  %v1105_v62 = vld [vmem:[#allocation2 + $0x138] sm:$0xff] }
 0x4fe   :  { %3939 = vmatpush1.bf16.msra.mxu0 %v1230_v63  ;;  %3813 = vmatprep.subr.bf16.mxu1 %v1237_v0  ;;  %v1104_v63 = vld [vmem:[#allocation2 + $0x130] sm:$0xff]  ;;  %v1113_v0 = vld [vmem:[#allocation2 + $0x178] sm:$0xff] }
 0x4ff   :  { %3941 = vmatprep.subr.bf16.mxu0 %v1239_v1  ;;  %v1112_v1 = vld [vmem:[#allocation2 + $0x170] sm:$0xff] }
 0x501   :  { %3815 = vmatpush1.bf16.msra.mxu1 %v1236_v2  ;;  %v1121_v2 = vld [vmem:[#allocation2 + $0x1b8] sm:$0xff] }
 0x502   :  { %3943 = vmatpush1.bf16.msra.mxu0 %v1238_v3  ;;  %3817 = vmatprep.subr.bf16.mxu1 %v1245_v4  ;;  %v1129_v3 = vld [vmem:[#allocation2 + $0x1f8] sm:$0xff]  ;;  %v1128_v4 = vld [vmem:[#allocation2 + $0x1f0] sm:$0xff] }
 0x503   :  { %3945 = vmatprep.subr.bf16.mxu0 %v1247_v5  ;;  %v1137_v5 = vld [vmem:[#allocation2 + $0x238] sm:$0xff] }
 0x505   :  { %3819 = vmatpush1.bf16.msra.mxu1 %v1244_v6  ;;  %v1136_v6 = vld [vmem:[#allocation2 + $0x230] sm:$0xff] }
 0x506   :  { %3947 = vmatpush1.bf16.msra.mxu0 %v1246_v7  ;;  %3821 = vmatprep.subr.bf16.mxu1 %v1253_v8  ;;  %v1145_v7 = vld [vmem:[#allocation2 + $0x278] sm:$0xff]  ;;  %v1144_v8 = vld [vmem:[#allocation2 + $0x270] sm:$0xff] }
 0x507   :  { %3949 = vmatprep.subr.bf16.mxu0 %v1255_v9  ;;  %v1153_v9 = vld [vmem:[#allocation2 + $0x2b8] sm:$0xff] }
 0x509   :  { %3823 = vmatpush1.bf16.msra.mxu1 %v1252_v10  ;;  %v1152_v10 = vld [vmem:[#allocation2 + $0x2b0] sm:$0xff] }
 0x50a   :  { %3951 = vmatpush1.bf16.msra.mxu0 %v1254_v11  ;;  %3825 = vmatprep.subr.bf16.mxu1 %v1261_v13  ;;  %v1161_v11 = vld [vmem:[#allocation2 + $0x2f8] sm:$0xff]  ;;  %v1160_v13 = vld [vmem:[#allocation2 + $0x2f0] sm:$0xff] }
 0x50b   :  { %3953 = vmatprep.subr.bf16.mxu0 %v1263_v14  ;;  %v1169_v14 = vld [vmem:[#allocation2 + $0x338] sm:$0xff] }
 0x50d   :  { %3827 = vmatpush1.bf16.msra.mxu1 %v1260_v45  ;;  %v1168_v45 = vld [vmem:[#allocation2 + $0x330] sm:$0xff] }
 0x50e   :  { %3955 = vmatpush1.bf16.msra.mxu0 %v1262_v46  ;;  %3829 = vmatprep.subr.bf16.mxu1 %v1269_v19  ;;  %v1177_v46 = vld [vmem:[#allocation2 + $0x378] sm:$0xff]  ;;  %v1176_v19 = vld [vmem:[#allocation2 + $0x370] sm:$0xff] }
 0x50f   :  { %3957 = vmatprep.subr.bf16.mxu0 %v1271_v20  ;;  %v1185_v20 = vld [vmem:[#allocation2 + $0x3b8] sm:$0xff] }
 0x511   :  { %3831 = vmatpush1.bf16.msra.mxu1 %v1268_v21  ;;  %v1184_v21 = vld [vmem:[#allocation2 + $0x3b0] sm:$0xff] }
 0x512   :  { %3959 = vmatpush1.bf16.msra.mxu0 %v1270_v22  ;;  %3833 = vmatprep.subr.bf16.mxu1 %v1277_v23  ;;  %v1193_v22 = vld [vmem:[#allocation2 + $0x3f8] sm:$0xff]  ;;  %v1192_v23 = vld [vmem:[#allocation2 + $0x3f0] sm:$0xff] }
 0x513   :  { %3961 = vmatprep.subr.bf16.mxu0 %v1279_v24  ;;  %v1201_v24 = vld [vmem:[#allocation2 + $0x438] sm:$0xff] }
 0x515   :  { %3835 = vmatpush1.bf16.msra.mxu1 %v1276_v25  ;;  %v1200_v25 = vld [vmem:[#allocation2 + $0x430] sm:$0xff] }
 0x516   :  { %3963 = vmatpush1.bf16.msra.mxu0 %v1278_v26  ;;  %3837 = vmatprep.subr.bf16.mxu1 %v1285_v27  ;;  %v1209_v26 = vld [vmem:[#allocation2 + $0x478] sm:$0xff]  ;;  %v1208_v27 = vld [vmem:[#allocation2 + $0x470] sm:$0xff] }
 0x517   :  { %3965 = vmatprep.subr.bf16.mxu0 %v1287_v28  ;;  %v1217_v28 = vld [vmem:[#allocation2 + $0x4b8] sm:$0xff] }
 0x519   :  { %3839 = vmatpush1.bf16.msra.mxu1 %v1284_v29  ;;  %v1216_v29 = vld [vmem:[#allocation2 + $0x4b0] sm:$0xff] }
 0x51a   :  { %3967 = vmatpush1.bf16.msra.mxu0 %v1286_v30  ;;  %3841 = vmatprep.subr.bf16.mxu1 %v1293_v31  ;;  %v1225_v30 = vld [vmem:[#allocation2 + $0x4f8] sm:$0xff]  ;;  %v1224_v31 = vld [vmem:[#allocation2 + $0x4f0] sm:$0xff] }
 0x51b   :  { %3969 = vmatprep.subr.bf16.mxu0 %v1295_v32  ;;  %v1233_v32 = vld [vmem:[#allocation2 + $0x538] sm:$0xff] }
 0x51d   :  { %3843 = vmatpush1.bf16.msra.mxu1 %v1292_v33  ;;  %v1232_v33 = vld [vmem:[#allocation2 + $0x530] sm:$0xff] }
 0x51e   :  { %3971 = vmatpush1.bf16.msra.mxu0 %v1294_v34  ;;  %3845 = vmatprep.subr.bf16.mxu1 %v1301_v36  ;;  %v1241_v34 = vld [vmem:[#allocation2 + $0x578] sm:$0xff] }
 0x51f   :  { %3973 = vmatprep.subr.bf16.mxu0 %v1303_v38  ;;  %v1249_v38 = vld [vmem:[#allocation2 + $0x5b8] sm:$0xff] }
 0x521   :  { %3847 = vmatpush1.bf16.msra.mxu1 %v1300_v39 }
 0x522   :  { %3975 = vmatpush1.bf16.msra.mxu0 %v1302_v40  ;;  %3849 = vmatprep.subr.bf16.mxu1 %v1309_v41 }
 0x523   :  { %3977 = vmatprep.subr.bf16.mxu0 %v1311_v43 }
 0x525   :  { %3851 = vmatpush1.bf16.msra.mxu1 %v1308_v44 }
 0x526   :  { %3979 = vmatpush1.bf16.msra.mxu0 %v1310_v47  ;;  %3853 = vmatprep.subr.bf16.mxu1 %v1317_v48  ;;  %v1248_v47 = vld [vmem:[#allocation2 + $0x5b0] sm:$0xff] }
 0x527   :  { %3981 = vmatprep.subr.bf16.mxu0 %v1319_v49  ;;  %v1257_v49 = vld [vmem:[#allocation2 + $0x5f8] sm:$0xff] }
 0x529   :  { %3855 = vmatpush1.bf16.msra.mxu1 %v1316_v50 }
 0x52a   :  { %3983 = vmatpush1.bf16.msra.mxu0 %v1318_v51  ;;  %3985 = vmatprep.subr.bf16.mxu1 %v1073_v52 }
 0x52c   :  { %2112 = vmatmul.mubr.f32.vlgmr.msra.gmra.mrb[8].mxu1 %v5145_v17 }
 0x52d   :  { %2254 = vmatmul.mubr.f32.vlgmr.msra.gmra.mrb[6].mxu0 %v5145_v17  ;;  %3987 = vmatpush1.bf16.msra.mxu1 %v1072_v53  ;;  %v1256_v53 = vld [vmem:[#allocation2 + $0x5f0] sm:$0xff] }
 0x52e   :  { %2324 = vmatprep.mubr.f32.mxu1 %v5143_v16  ;;  %3989 = vmatprep.subr.bf16.mxu1 %v1081_v56  ;;  %v1120_v16 = vld [vmem:[#allocation2 + $0x1b0] sm:$0xff] }
 0x531   :  { %3991 = vmatpush1.bf16.msra.mxu1 %v1080_v57  ;;  %v1265_v57 = vld [vmem:[#allocation2 + $0x638] sm:$0xff] }
 0x532   :  { %3993 = vmatprep.subr.bf16.mxu1 %v1089_v58 }
 0x535   :  { %3995 = vmatpush1.bf16.msra.mxu1 %v1088_v59 }
 0x536   :  { %3997 = vmatprep.subr.bf16.mxu1 %v1097_v60 }
 0x539   :  { %3999 = vmatpush1.bf16.msra.mxu1 %v1096_v61  ;;  %v1264_v61 = vld [vmem:[#allocation2 + $0x630] sm:$0xff] }
 0x53a   :  { %4001 = vmatprep.subr.bf16.mxu1 %v1105_v62 }
 0x53d   :  { %4003 = vmatpush1.bf16.msra.mxu1 %v1104_v63  ;;  %v1273_v63 = vld [vmem:[#allocation2 + $0x678] sm:$0xff] }
 0x53e   :  { %4005 = vmatprep.subr.bf16.mxu1 %v1113_v0 }
 0x541   :  { %4007 = vmatpush1.bf16.msra.mxu1 %v1112_v1 }
 0x542   :  { %4009 = vmatprep.subr.bf16.mxu1 %v1121_v2 }
 0x545   :  { %4011 = vmatpush1.bf16.msra.mxu1 %v1120_v16  ;;  %v1272_v16 = vld [vmem:[#allocation2 + $0x670] sm:$0xff] }
 0x546   :  { %4013 = vmatprep.subr.bf16.mxu1 %v1129_v3 }
 0x549   :  { %4015 = vmatpush1.bf16.msra.mxu1 %v1128_v4  ;;  %v1281_v4 = vld [vmem:[#allocation2 + $0x6b8] sm:$0xff] }
 0x54a   :  { %4017 = vmatprep.subr.bf16.mxu1 %v1137_v5 }
 0x54d   :  { %4019 = vmatpush1.bf16.msra.mxu1 %v1136_v6 }
 0x54e   :  { %4021 = vmatprep.subr.bf16.mxu1 %v1145_v7 }
 0x551   :  { %4023 = vmatpush1.bf16.msra.mxu1 %v1144_v8  ;;  %v1280_v8 = vld [vmem:[#allocation2 + $0x6b0] sm:$0xff] }
 0x552   :  { %4025 = vmatprep.subr.bf16.mxu1 %v1153_v9 }
 0x555   :  { %4027 = vmatpush1.bf16.msra.mxu1 %v1152_v10  ;;  %v1289_v10 = vld [vmem:[#allocation2 + $0x6f8] sm:$0xff] }
 0x556   :  { %4029 = vmatprep.subr.bf16.mxu1 %v1161_v11 }
 0x559   :  { %4031 = vmatpush1.bf16.msra.mxu1 %v1160_v13 }
 0x55a   :  { %4033 = vmatprep.subr.bf16.mxu1 %v1169_v14 }
 0x55d   :  { %4035 = vmatpush1.bf16.msra.mxu1 %v1168_v45  ;;  %v1288_v45 = vld [vmem:[#allocation2 + $0x6f0] sm:$0xff] }
 0x55e   :  { %4037 = vmatprep.subr.bf16.mxu1 %v1177_v46 }
 0x561   :  { %4039 = vmatpush1.bf16.msra.mxu1 %v1176_v19  ;;  %v1297_v19 = vld [vmem:[#allocation2 + $0x738] sm:$0xff] }
 0x562   :  { %4041 = vmatprep.subr.bf16.mxu1 %v1185_v20 }
 0x565   :  { %4043 = vmatpush1.bf16.msra.mxu1 %v1184_v21 }
 0x566   :  { %4045 = vmatprep.subr.bf16.mxu1 %v1193_v22 }
 0x569   :  { %4047 = vmatpush1.bf16.msra.mxu1 %v1192_v23  ;;  %v1296_v23 = vld [vmem:[#allocation2 + $0x730] sm:$0xff] }
 0x56a   :  { %4049 = vmatprep.subr.bf16.mxu1 %v1201_v24 }
 0x56c   :  { %2325 = vmatmul.mubr.f32.vlgmr.msra.gmra.mrb[10].mxu1 %v5141_v15  ;;  %v1240_v15 = vld [vmem:[#allocation2 + $0x570] sm:$0xff] }
 0x56d   :  { %4051 = vmatpush1.bf16.msra.mxu1 %v1200_v25  ;;  %2395 = vmatprep.mubr.f32.mxu1 %v5147_v18  ;;  %v1305_v25 = vld [vmem:[#allocation2 + $0x778] sm:$0xff] }
 0x56e   :  { %4053 = vmatprep.subr.bf16.mxu1 %v1209_v26 }
 0x571   :  { %4055 = vmatpush1.bf16.msra.mxu1 %v1208_v27 }
 0x572   :  { %4057 = vmatprep.subr.bf16.mxu1 %v1217_v28 }
 0x575   :  { %4059 = vmatpush1.bf16.msra.mxu1 %v1216_v29  ;;  %v1304_v29 = vld [vmem:[#allocation2 + $0x770] sm:$0xff] }
 0x576   :  { %4061 = vmatprep.subr.bf16.mxu1 %v1225_v30 }
 0x579   :  { %4063 = vmatpush1.bf16.msra.mxu1 %v1224_v31  ;;  %v1313_v31 = vld [vmem:[#allocation2 + $0x7b8] sm:$0xff] }
 0x57a   :  { %4065 = vmatprep.subr.bf16.mxu1 %v1233_v32 }
 0x57d   :  { %4067 = vmatpush1.bf16.msra.mxu1 %v1232_v33 }
 0x57e   :  { %4069 = vmatprep.subr.bf16.mxu1 %v1241_v34 }
 0x57f   :  { %v1900_v36 = vpop.f32.mrb[6].mxu1 }
 0x580   :  { %v1971_v18 = vpop.f32.mrb[4].mxu0  ;;  %v1902_v40 = vpop.f32.mrb[7].mxu1 }
 0x581   :  { %v1972_v39 = vadd.f32 %v1971_v18, %v1900_v36  ;;  %v1973_v41 = vpop.f32.mrb[5].mxu0  ;;  %4071 = vmatpush1.bf16.msra.mxu1 %v1240_v15  ;;  %v1312_v15 = vld [vmem:[#allocation2 + $0x7b0] sm:$0xff]  ;;  %v1321_v18 = vld [vmem:[#allocation2 + $0x7f8] sm:$0xff] }
 0x582   :  { %v1974_v43 = vadd.f32 %v1973_v41, %v1902_v40  ;;  %4073 = vmatprep.subr.bf16.mxu1 %v1249_v38  ;;  %v1320_v38 = vld [vmem:[#allocation2 + $0x7f0] sm:$0xff] }
 0x583   :  { %v2402_v44 = vrot.slane %v1972_v39, 4 }
 0x584   :  { %v2408_v48 = vrot.slane %v1974_v43, 4 }
 0x585   :  { %v2403_v50 = vadd.f32 %v2402_v44, %v1972_v39  ;;  %4075 = vmatpush1.bf16.msra.mxu1 %v1248_v47 }
 0x586   :  { %v2409_v51 = vadd.f32 %v2408_v48, %v1974_v43  ;;  %4077 = vmatprep.subr.bf16.mxu1 %v1257_v49 }
 0x587   :  { %v2404_v52 = vrot.slane %v2403_v50, 2 }
 0x588   :  { %v2410_v56 = vrot.slane %v2409_v51, 2 }
 0x589   :  { %v2405_v58 = vadd.f32 %v2404_v52, %v2403_v50  ;;  %4079 = vmatpush1.bf16.msra.mxu1 %v1256_v53 }
 0x58a   :  { %v2411_v59 = vadd.f32 %v2410_v56, %v2409_v51  ;;  %4081 = vmatprep.subr.bf16.mxu1 %v1265_v57 }
 0x58b   :  { %v2406_v60 = vrot.slane %v2405_v58, 1 }
 0x58c   :  { %v2412_v62 = vrot.slane %v2411_v59, 1 }
 0x58d   :  { %v2407_v0 = vadd.f32 %v2406_v60, %v2405_v58  ;;  %4083 = vmatpush1.bf16.msra.mxu1 %v1264_v61 }
 0x58e   :  { %v2413_v1 = vadd.f32 %v2412_v62, %v2411_v59  ;;  %4085 = vmatprep.subr.bf16.mxu1 %v1273_v63 }
 0x58f   :  { %v2450_v2 = vmul.f32 0.125, %v2407_v0 }
 0x590   :  { %v2451_v3 = vmul.f32 0.125, %v2413_v1 }
 0x591   :  { %v5164_v5 = vsub.f32 %v1972_v39, %v2450_v2  ;;  %4087 = vmatpush1.bf16.msra.mxu1 %v1272_v16 }
 0x592   :  { %v5166_v6 = vsub.f32 %v1974_v43, %v2451_v3  ;;  %4089 = vmatprep.subr.bf16.mxu1 %v1281_v4 }
 0x593   :  { %v2466_v7 = vmul.f32 %v5164_v5, %v5164_v5 }
 0x594   :  { %v2467_v9 = vmul.f32 %v5166_v6, %v5166_v6 }
 0x595   :  { %v2474_v11 = vrot.slane %v2466_v7, 4  ;;  %4091 = vmatpush1.bf16.msra.mxu1 %v1280_v8 }
 0x596   :  { %v2480_v13 = vrot.slane %v2467_v9, 4  ;;  %4093 = vmatprep.subr.bf16.mxu1 %v1289_v10 }
 0x597   :  { %v2475_v14 = vadd.f32 %v2474_v11, %v2466_v7 }
 0x598   :  { %v2481_v46 = vadd.f32 %v2480_v13, %v2467_v9 }
 0x599   :  { %v2476_v20 = vrot.slane %v2475_v14, 2  ;;  %4095 = vmatpush1.bf16.msra.mxu1 %v1288_v45 }
 0x59a   :  { %v2482_v21 = vrot.slane %v2481_v46, 2  ;;  %4097 = vmatprep.subr.bf16.mxu1 %v1297_v19 }
 0x59b   :  { %v2477_v22 = vadd.f32 %v2476_v20, %v2475_v14 }
 0x59c   :  { %v2483_v24 = vadd.f32 %v2482_v21, %v2481_v46 }
 0x59d   :  { %v2478_v26 = vrot.slane %v2477_v22, 1  ;;  %4099 = vmatpush1.bf16.msra.mxu1 %v1296_v23 }
 0x59e   :  { %v2484_v27 = vrot.slane %v2483_v24, 1  ;;  %4101 = vmatprep.subr.bf16.mxu1 %v1305_v25 }
 0x59f   :  { %v2479_v28 = vadd.f32 %v2478_v26, %v2477_v22 }
 0x5a0   :  { %v2485_v30 = vadd.f32 %v2484_v27, %v2483_v24 }
 0x5a1   :  { %v2522_v32 = vmul.f32 0.125, %v2479_v28  ;;  %4103 = vmatpush1.bf16.msra.mxu1 %v1304_v29 }
 0x5a2   :  { %v2523_v33 = vmul.f32 0.125, %v2485_v30  ;;  %4105 = vmatprep.subr.bf16.mxu1 %v1313_v31 }
 0x5a3   :  { %v2531_v34 = vadd.f32 1e-05, %v2522_v32 }
 0x5a4   :  { %v2532_v36 = vadd.f32 1e-05, %v2523_v33 }
 0x5a5   :  { %4608 = vrsqrt.f32 %v2531_v34  ;;  %4107 = vmatpush1.bf16.msra.mxu1 %v1312_v15 }
 0x5a6   :  { %4610 = vrsqrt.f32 %v2532_v36  ;;  %4109 = vmatprep.subr.bf16.mxu1 %v1321_v18 }
 0x5a9   :  { %4111 = vmatpush1.bf16.msra.mxu1 %v1320_v38 }
 0x5ac   :  { %2396 = vmatmul.mubr.f32.vlgmr.msra.gmra.mrb[10].mxu1 %v5145_v17 }
 0x5af   :  { %v5173_v39 = vpop.eup %4608 }
 0x5b0   :  { %v5175_v40 = vpop.eup %4610 }
 0x5b1   :  { %v2555_v41 = vcombine.low %v5173_v39, %v5175_v40 }
 0x5ff   :  { %v2113_v43 = vpop.f32.mrb[8].mxu1 }
 0x600   :  { %v2255_v44 = vpop.f32.mrb[6].mxu0  ;;  %v2414_v47 = vrot.slane %v2113_v43, 4  ;;  %v2115_v48 = vpop.f32.mrb[9].mxu1 }
 0x601   :  { %v2426_v49 = vrot.slane %v2255_v44, 4  ;;  %v2257_v50 = vpop.f32.mrb[7].mxu0  ;;  %v2420_v51 = vrot.slane %v2115_v48, 4 }
 0x602   :  { %v2432_v52 = vrot.slane %v2257_v50, 4  ;;  %v2415_v53 = vadd.f32 %v2414_v47, %v2113_v43 }
 0x603   :  { %v2427_v56 = vadd.f32 %v2426_v49, %v2255_v44  ;;  %v2421_v57 = vadd.f32 %v2420_v51, %v2115_v48 }
 0x604   :  { %v2433_v58 = vadd.f32 %v2432_v52, %v2257_v50  ;;  %v2416_v17 = vrot.slane %v2415_v53, 2 }
 0x605   :  { %v2428_v59 = vrot.slane %v2427_v56, 2  ;;  %v2422_v60 = vrot.slane %v2421_v57, 2 }
 0x606   :  { %v2434_v61 = vrot.slane %v2433_v58, 2  ;;  %v2417_v62 = vadd.f32 %v2416_v17, %v2415_v53 }
 0x607   :  { %v2429_v63 = vadd.f32 %v2428_v59, %v2427_v56  ;;  %v2423_v0 = vadd.f32 %v2422_v60, %v2421_v57 }
 0x608   :  { %v2435_v1 = vadd.f32 %v2434_v61, %v2433_v58  ;;  %v2418_v2 = vrot.slane %v2417_v62, 1 }
 0x609   :  { %v2430_v16 = vrot.slane %v2429_v63, 1  ;;  %v2424_v3 = vrot.slane %v2423_v0, 1 }
 0x60a   :  { %v2436_v4 = vrot.slane %v2435_v1, 1  ;;  %v2419_v7 = vadd.f32 %v2418_v2, %v2417_v62 }
 0x60b   :  { %v2431_v8 = vadd.f32 %v2430_v16, %v2429_v63  ;;  %v2425_v9 = vadd.f32 %v2424_v3, %v2423_v0 }
 0x60c   :  { %v2437_v10 = vadd.f32 %v2436_v4, %v2435_v1  ;;  %v2452_v11 = vmul.f32 0.125, %v2419_v7  ;;  %v2565_v7 = vrot.slane %v2555_v41, %v5090_v37 }
 0x60d   :  { %v2454_v13 = vmul.f32 0.125, %v2431_v8  ;;  %v2453_v14 = vmul.f32 0.125, %v2425_v9 }
 0x60e   :  { %v2455_v45 = vmul.f32 0.125, %v2437_v10  ;;  %v5179_v46 = vsub.f32 %v2113_v43, %v2452_v11 }
 0x60f   :  { %v5181_v19 = vsub.f32 %v2255_v44, %v2454_v13  ;;  %v5183_v20 = vsub.f32 %v2115_v48, %v2453_v14 }
 0x610   :  { %v5185_v21 = vsub.f32 %v2257_v50, %v2455_v45  ;;  %v2468_v22 = vmul.f32 %v5179_v46, %v5179_v46 }
 0x611   :  { %v2470_v23 = vmul.f32 %v5181_v19, %v5181_v19  ;;  %v2469_v24 = vmul.f32 %v5183_v20, %v5183_v20 }
 0x612   :  { %v2471_v25 = vmul.f32 %v5185_v21, %v5185_v21  ;;  %v2486_v26 = vrot.slane %v2468_v22, 4 }
 0x613   :  { %v2498_v27 = vrot.slane %v2470_v23, 4  ;;  %v2492_v28 = vrot.slane %v2469_v24, 4 }
 0x614   :  { %v2504_v29 = vrot.slane %v2471_v25, 4  ;;  %v2487_v30 = vadd.f32 %v2486_v26, %v2468_v22 }
 0x615   :  { %v2499_v31 = vadd.f32 %v2498_v27, %v2470_v23  ;;  %v2493_v32 = vadd.f32 %v2492_v28, %v2469_v24 }
 0x616   :  { %v2505_v33 = vadd.f32 %v2504_v29, %v2471_v25  ;;  %v2488_v34 = vrot.slane %v2487_v30, 2 }
 0x617   :  { %v2500_v15 = vrot.slane %v2499_v31, 2  ;;  %v2494_v36 = vrot.slane %v2493_v32, 2 }
 0x618   :  { %v2506_v18 = vrot.slane %v2505_v33, 2  ;;  %v2489_v38 = vadd.f32 %v2488_v34, %v2487_v30 }
 0x619   :  { %v2501_v43 = vadd.f32 %v2500_v15, %v2499_v31  ;;  %v2495_v44 = vadd.f32 %v2494_v36, %v2493_v32 }
 0x61a   :  { %v2507_v47 = vadd.f32 %v2506_v18, %v2505_v33  ;;  %v2490_v48 = vrot.slane %v2489_v38, 1 }
 0x61b   :  { %v2502_v49 = vrot.slane %v2501_v43, 1  ;;  %v2496_v50 = vrot.slane %v2495_v44, 1 }
 0x61c   :  { %v2508_v51 = vrot.slane %v2507_v47, 1  ;;  %v2491_v52 = vadd.f32 %v2490_v48, %v2489_v38 }
 0x61d   :  { %v2503_v53 = vadd.f32 %v2502_v49, %v2501_v43  ;;  %v2497_v56 = vadd.f32 %v2496_v50, %v2495_v44 }
 0x61e   :  { %v2509_v57 = vadd.f32 %v2508_v51, %v2507_v47  ;;  %v2524_v58 = vmul.f32 0.125, %v2491_v52 }
 0x61f   :  { %v2526_v17 = vmul.f32 0.125, %v2503_v53  ;;  %v2525_v59 = vmul.f32 0.125, %v2497_v56 }
 0x620   :  { %v2527_v60 = vmul.f32 0.125, %v2509_v57  ;;  %v2533_v61 = vadd.f32 1e-05, %v2524_v58 }
 0x621   :  { %v2535_v62 = vadd.f32 1e-05, %v2526_v17  ;;  %v2534_v63 = vadd.f32 1e-05, %v2525_v59 }
 0x622   :  { %v2536_v0 = vadd.f32 1e-05, %v2527_v60  ;;  %4612 = vrsqrt.f32 %v2533_v61 }
 0x623   :  { %4614 = vrsqrt.f32 %v2534_v63 }
 0x624   :  { %4616 = vrsqrt.f32 %v2535_v62 }
 0x625   :  { %4618 = vrsqrt.f32 %v2536_v0 }
 0x62c   :  { %v4613_v1 = vpop.eup %4612 }
 0x62d   :  { %v4615_v2 = vpop.eup %4614 }
 0x62e   :  { %v4617_v16 = vpop.eup %4616  ;;  %v2556_v3 = vcombine.low %v4613_v1, %v4615_v2  ;;  %v2655_v2 = vld [vmem:[#allocation15] sm:$0xff] }
 0x62f   :  { %v4619_v4 = vpop.eup %4618 }
 0x630   :  { %v2572_v8 = vrot.slane %v2556_v3, %v5090_v37  ;;  %v2557_v9 = vcombine.low %v4617_v16, %v4619_v4  ;;  %v2530_v16 = vld [vmem:[#allocation13] sm:$0xff]  ;;  %v2625_v4 = vsub.s32 4, %v5087_v35 }
 0x632   :  { %v2587_v10 = vcombine.low %v2565_v7, %v2572_v8  ;;  %v2579_v61 = vrot.slane %v2557_v9, %v5090_v37  ;;  %v2629_v7 = vsub.s32 5, %v5087_v35  ;;  %v2633_v8 = vsub.s32 6, %v5087_v35 }
 0x633   :  { %v2660_v9 = vrot.slane %v2655_v2, %v5097_v42 }
 0x634   :  { %v2595_v0 = vrot.slane %v2587_v10, %v5090_v37  ;;  %v2668_v10 = vrot.slane %v2655_v2, %v5126_v54 }
 0x67f   :  { %v2397_v11 = vpop.f32.mrb[10].mxu1 }
 0x680   :  { %v2438_v13 = vrot.slane %v2397_v11, 4  ;;  %v2399_v14 = vpop.f32.mrb[11].mxu1 }
 0x681   :  { %v2444_v45 = vrot.slane %v2399_v14, 4 }
 0x682   :  { %v2439_v22 = vadd.f32 %v2438_v13, %v2397_v11 }
 0x683   :  { %v2445_v23 = vadd.f32 %v2444_v45, %v2399_v14  ;;  %v2676_v45 = vrot.slane %v2655_v2, %v2625_v4 }
 0x684   :  { %v2440_v24 = vrot.slane %v2439_v22, 2 }
 0x685   :  { %v2446_v25 = vrot.slane %v2445_v23, 2 }
 0x686   :  { %v2441_v26 = vadd.f32 %v2440_v24, %v2439_v22  ;;  %v2680_v22 = vrot.slane %v2655_v2, %v2629_v7 }
 0x687   :  { %v2447_v27 = vadd.f32 %v2446_v25, %v2445_v23  ;;  %v2684_v23 = vrot.slane %v2655_v2, %v2633_v8 }
 0x688   :  { %v2442_v28 = vrot.slane %v2441_v26, 1 }
 0x689   :  { %v2448_v29 = vrot.slane %v2447_v27, 1 }
 0x68a   :  { %v2443_v30 = vadd.f32 %v2442_v28, %v2441_v26 }
 0x68b   :  { %v2449_v31 = vadd.f32 %v2448_v29, %v2447_v27 }
 0x68c   :  { %v2456_v39 = vmul.f32 0.125, %v2443_v30 }
 0x68d   :  { %v2457_v40 = vmul.f32 0.125, %v2449_v31 }
 0x68e   :  { %v2464_v41 = vsub.f32 %v2397_v11, %v2456_v39  ;;  %v2637_v11 = vsub.s32 7, %v5087_v35 }
 0x68f   :  { %v2465_v32 = vsub.f32 %v2399_v14, %v2457_v40  ;;  %v2664_v14 = vrot.slane %v2655_v2, %v5101_v12 }
 0x690   :  { %v2472_v33 = vmul.f32 %v2464_v41, %v2464_v41  ;;  %v2688_v24 = vrot.slane %v2655_v2, %v2637_v11 }
 0x691   :  { %v2473_v34 = vmul.f32 %v2465_v32, %v2465_v32 }
 0x692   :  { %v2510_v15 = vrot.slane %v2472_v33, 4 }
 0x693   :  { %v2516_v36 = vrot.slane %v2473_v34, 4 }
 0x694   :  { %v2511_v18 = vadd.f32 %v2510_v15, %v2472_v33 }
 0x695   :  { %v2517_v38 = vadd.f32 %v2516_v36, %v2473_v34 }
 0x696   :  { %v2512_v43 = vrot.slane %v2511_v18, 2 }
 0x697   :  { %v2518_v44 = vrot.slane %v2517_v38, 2 }
 0x698   :  { %v2513_v47 = vadd.f32 %v2512_v43, %v2511_v18 }
 0x699   :  { %v2519_v48 = vadd.f32 %v2518_v44, %v2517_v38 }
 0x69a   :  { %v2514_v49 = vrot.slane %v2513_v47, 1 }
 0x69b   :  { %v2520_v50 = vrot.slane %v2519_v48, 1 }
 0x69c   :  { %v2515_v51 = vadd.f32 %v2514_v49, %v2513_v47 }
 0x69d   :  { %v2521_v52 = vadd.f32 %v2520_v50, %v2519_v48 }
 0x69e   :  { %v2528_v53 = vmul.f32 0.125, %v2515_v51 }
 0x69f   :  { %v2529_v56 = vmul.f32 0.125, %v2521_v52 }
 0x6a0   :  { %v2537_v57 = vadd.f32 1e-05, %v2528_v53 }
 0x6a1   :  { %v2538_v58 = vadd.f32 1e-05, %v2529_v56 }
 0x6a2   :  { %4620 = vrsqrt.f32 %v2537_v57 }
 0x6a3   :  { %4622 = vrsqrt.f32 %v2538_v58 }
 0x6ac   :  { %v4621_v17 = vpop.eup %4620 }
 0x6ad   :  { %v4623_v59 = vpop.eup %4622 }
 0x6ae   :  { %v2558_v60 = vcombine.low %v4621_v17, %v4623_v59 }
 0x6b0   :  { %v2586_v62 = vrot.slane %v2558_v60, %v5090_v37 }
 0x6b2   :  { %v2588_v63 = vcombine.low %v2579_v61, %v2586_v62 }
 0x6b4   :  { %v2602_v1 = vrot.slane %v2588_v63, %v5090_v37  ;;  %v2672_v37 = vrot.slane %v2655_v2, %v5129_v55 }
 0x6b6   :  { %v2603_v3 = vcombine.low %v2595_v0, %v2602_v1 }
 0x6b8   :  { %v2605_v13 = vmul.f32 %v2603_v3, %v2530_v16 }
 0x6ba   :  { %v2610_v25 = vrot.slane %v2605_v13, %v5097_v42  ;;  %v2614_v26 = vrot.slane %v2605_v13, %v5101_v12  ;;  %v2618_v27 = vrot.slane %v2605_v13, %v5126_v54  ;;  %v2622_v35 = vrot.slane %v2605_v13, %v5129_v55 }
 0x6bb   :  { %v2626_v28 = vrot.slane %v2605_v13, %v2625_v4  ;;  %v2630_v29 = vrot.slane %v2605_v13, %v2629_v7  ;;  %v2634_v30 = vrot.slane %v2605_v13, %v2633_v8  ;;  %v2638_v31 = vrot.slane %v2605_v13, %v2637_v11 }
 0x6bc   :  { %v2647_v39 = vmul.f32 %v2610_v25, %v5164_v5  ;;  %v2648_v40 = vmul.f32 %v2614_v26, %v5166_v6  ;;  %v2649_v33 = vmul.f32 %v2618_v27, %v5179_v46  ;;  %v2650_v34 = vmul.f32 %v2622_v35, %v5183_v20 }
 0x6bd   :  { %v2651_v15 = vmul.f32 %v2626_v28, %v5181_v19  ;;  %v2652_v36 = vmul.f32 %v2630_v29, %v5185_v21  ;;  %v2653_v18 = vmul.f32 %v2634_v30, %v2464_v41  ;;  %v2654_v54 = vmul.f32 %v2638_v31, %v2465_v32 }
 0x6be   :  { %v5222_v38 = vadd.f32 %v2660_v9, %v2647_v39  ;;  %v2698_v55 = vadd.f32 %v2664_v14, %v2648_v40  ;;  %v5224_v43 = vadd.f32 %v2668_v10, %v2649_v33  ;;  %v5226_v44 = vadd.f32 %v2672_v37, %v2650_v34 }
 0x6bf   :  { %v5228_v5 = vadd.f32 %v2676_v45, %v2651_v15  ;;  %v5230_v6 = vadd.f32 %v2680_v22, %v2652_v36  ;;  %v5232_v46 = vadd.f32 %v2684_v23, %v2653_v18  ;;  %v5234_v20 = vadd.f32 %v2688_v24, %v2654_v54 }
 0x6c0   :  { %v5237_v19 = vmul.f32 0.2, %v5222_v38  ;;  %v2706_v21 = vmul.f32 0.2, %v2698_v55  ;;  %v5240_v41 = vmul.f32 0.2, %v5224_v43 }
 0x6c1   :  { %v5243_v32 = vmul.f32 0.2, %v5226_v44  ;;  %v5246_v47 = vmul.f32 0.2, %v5228_v5  ;;  %v5249_v48 = vmul.f32 0.2, %v5230_v6 }
 0x6c2   :  { %v5252_v49 = vmul.f32 0.2, %v5232_v46  ;;  %v5255_v50 = vmul.f32 0.2, %v5234_v20  ;;  %v2713_v51 = vmax.f32 %v5222_v38, %v5237_v19  ;;  %v2714_v52 = vmax.f32 %v2698_v55, %v2706_v21 }
 0x6c3   :  { %v2715_v53 = vmax.f32 %v5224_v43, %v5240_v41  ;;  %v2716_v56 = vmax.f32 %v5226_v44, %v5243_v32  ;;  %v2717_v57 = vmax.f32 %v5228_v5, %v5246_v47  ;;  %v2718_v58 = vmax.f32 %v5230_v6, %v5249_v48 }
 0x6c4   :  { %v2719_v17 = vmax.f32 %v5232_v46, %v5252_v49  ;;  %v2720_v59 = vmax.f32 %v5234_v20, %v5255_v50 }
 0x6c5   :  { %4816 = dma.done.wait [#allocation4 + $0x1], 16384 }
 0x6c6   :  { %4817 = vsyncadd [#allocation4 + $0x1], 4294950912  ;;  %3185 = vmatprep.mubr.f32.mxu0 %v2714_v52  ;;  %v2726_v60 = vld [vmem:[#allocation3 + $0x8] sm:$0xff]  ;;  %v2725_v61 = vld [vmem:[#allocation3] sm:$0xff] }
 0x6c7   :  { %v2728_v62 = vld [vmem:[#allocation3 + $0x18] sm:$0xff]  ;;  %4113 = vmatprep.subr.bf16.mxu0 %v2726_v60  ;;  %v2727_v63 = vld [vmem:[#allocation3 + $0x10] sm:$0xff]  ;;  %v2730_v0 = vld [vmem:[#allocation3 + $0x28] sm:$0xff] }
 0x6c8   :  { %4115 = vmatpush1.bf16.msra.mxu0 %v2725_v61  ;;  %v2729_v1 = vld [vmem:[#allocation3 + $0x20] sm:$0xff]  ;;  %v2732_v2 = vld [vmem:[#allocation3 + $0x38] sm:$0xff]  ;;  %v2731_v16 = vld [vmem:[#allocation3 + $0x30] sm:$0xff] }
 0x6c9   :  { %4117 = vmatprep.subr.bf16.mxu0 %v2728_v62  ;;  %v2734_v3 = vld [vmem:[#allocation3 + $0x48] sm:$0xff]  ;;  %v2733_v4 = vld [vmem:[#allocation3 + $0x40] sm:$0xff]  ;;  %v2736_v7 = vld [vmem:[#allocation3 + $0x58] sm:$0xff] }
 0x6ca   :  { %v2735_v8 = vld [vmem:[#allocation3 + $0x50] sm:$0xff]  ;;  %v2738_v11 = vld [vmem:[#allocation3 + $0x68] sm:$0xff]  ;;  %v2737_v9 = vld [vmem:[#allocation3 + $0x60] sm:$0xff] }
 0x6cb   :  { %v2740_v13 = vld [vmem:[#allocation3 + $0x78] sm:$0xff]  ;;  %v2739_v14 = vld [vmem:[#allocation3 + $0x70] sm:$0xff]  ;;  %v2742_v10 = vld [vmem:[#allocation3 + $0x88] sm:$0xff] }
 0x6cc   :  { %4119 = vmatpush1.bf16.msra.mxu0 %v2727_v63  ;;  %v2741_v37 = vld [vmem:[#allocation3 + $0x80] sm:$0xff]  ;;  %v2744_v45 = vld [vmem:[#allocation3 + $0x98] sm:$0xff]  ;;  %v2743_v22 = vld [vmem:[#allocation3 + $0x90] sm:$0xff] }
 0x6cd   :  { %4121 = vmatprep.subr.bf16.mxu0 %v2730_v0  ;;  %v2746_v23 = vld [vmem:[#allocation3 + $0xa8] sm:$0xff]  ;;  %v2745_v24 = vld [vmem:[#allocation3 + $0xa0] sm:$0xff]  ;;  %v2748_v25 = vld [vmem:[#allocation3 + $0xb8] sm:$0xff] }
 0x6ce   :  { %v2747_v26 = vld [vmem:[#allocation3 + $0xb0] sm:$0xff]  ;;  %v2750_v27 = vld [vmem:[#allocation3 + $0xc8] sm:$0xff]  ;;  %v2749_v35 = vld [vmem:[#allocation3 + $0xc0] sm:$0xff] }
 0x6cf   :  { %v2752_v28 = vld [vmem:[#allocation3 + $0xd8] sm:$0xff]  ;;  %v2751_v29 = vld [vmem:[#allocation3 + $0xd0] sm:$0xff]  ;;  %v2754_v30 = vld [vmem:[#allocation3 + $0xe8] sm:$0xff] }
 0x6d0   :  { %4123 = vmatpush1.bf16.msra.mxu0 %v2729_v1  ;;  %v2753_v31 = vld [vmem:[#allocation3 + $0xe0] sm:$0xff]  ;;  %v2756_v39 = vld [vmem:[#allocation3 + $0xf8] sm:$0xff]  ;;  %v2755_v40 = vld [vmem:[#allocation3 + $0xf0] sm:$0xff] }
 0x6d1   :  { %4125 = vmatprep.subr.bf16.mxu0 %v2732_v2  ;;  %v2758_v33 = vld [vmem:[#allocation3 + $0x108] sm:$0xff]  ;;  %v2757_v34 = vld [vmem:[#allocation3 + $0x100] sm:$0xff]  ;;  %v2760_v15 = vld [vmem:[#allocation3 + $0x118] sm:$0xff] }
 0x6d2   :  { %v2759_v36 = vld [vmem:[#allocation3 + $0x110] sm:$0xff]  ;;  %v2762_v18 = vld [vmem:[#allocation3 + $0x128] sm:$0xff]  ;;  %v2761_v54 = vld [vmem:[#allocation3 + $0x120] sm:$0xff] }
 0x6d3   :  { %v2764_v55 = vld [vmem:[#allocation3 + $0x138] sm:$0xff]  ;;  %v2763_v21 = vld [vmem:[#allocation3 + $0x130] sm:$0xff]  ;;  %v2766_v52 = vld [vmem:[#allocation3 + $0x148] sm:$0xff] }
 0x6d4   :  { %4127 = vmatpush1.bf16.msra.mxu0 %v2731_v16  ;;  %v2765_v38 = vld [vmem:[#allocation3 + $0x140] sm:$0xff]  ;;  %v2768_v19 = vld [vmem:[#allocation3 + $0x158] sm:$0xff]  ;;  %v2770_v44 = vld [vmem:[#allocation3 + $0x168] sm:$0xff] }
 0x6d5   :  { %4129 = vmatprep.subr.bf16.mxu0 %v2734_v3  ;;  %v2769_v32 = vld [vmem:[#allocation3 + $0x160] sm:$0xff]  ;;  %v2771_v60 = vld [vmem:[#allocation3 + $0x170] sm:$0xff]  ;;  %v2774_v61 = vld [vmem:[#allocation3 + $0x188] sm:$0xff] }
 0x6d6   :  { %v2773_v62 = vld [vmem:[#allocation3 + $0x180] sm:$0xff]  ;;  %v2776_v63 = vld [vmem:[#allocation3 + $0x198] sm:$0xff]  ;;  %v2775_v0 = vld [vmem:[#allocation3 + $0x190] sm:$0xff] }
 0x6d7   :  { %v2778_v1 = vld [vmem:[#allocation3 + $0x1a8] sm:$0xff]  ;;  %v2777_v2 = vld [vmem:[#allocation3 + $0x1a0] sm:$0xff]  ;;  %v2780_v16 = vld [vmem:[#allocation3 + $0x1b8] sm:$0xff] }
 0x6d8   :  { %4131 = vmatpush1.bf16.msra.mxu0 %v2733_v4  ;;  %v2779_v3 = vld [vmem:[#allocation3 + $0x1b0] sm:$0xff]  ;;  %v2782_v4 = vld [vmem:[#allocation3 + $0x1c8] sm:$0xff]  ;;  %v2797_v43 = vld [vmem:[#allocation3 + $0x240] sm:$0xff] }
 0x6d9   :  { %4133 = vmatprep.subr.bf16.mxu0 %v2736_v7  ;;  %v2781_v7 = vld [vmem:[#allocation3 + $0x1c0] sm:$0xff]  ;;  %v2800_v41 = vld [vmem:[#allocation3 + $0x258] sm:$0xff]  ;;  %v2802_v6 = vld [vmem:[#allocation3 + $0x268] sm:$0xff] }
 0x6da   :  { %v2801_v48 = vld [vmem:[#allocation3 + $0x260] sm:$0xff]  ;;  %v2832_v47 = vld [vmem:[#allocation3 + $0x358] sm:$0xff]  ;;  %v2834_v20 = vld [vmem:[#allocation3 + $0x368] sm:$0xff] }
 0x6db   :  { %v2829_v5 = vld [vmem:[#allocation3 + $0x340] sm:$0xff] }
 0x6dc   :  { %4135 = vmatpush1.bf16.msra.mxu0 %v2735_v8  ;;  %v2784_v8 = vld [vmem:[#allocation3 + $0x1d8] sm:$0xff]  ;;  %v2833_v50 = vld [vmem:[#allocation3 + $0x360] sm:$0xff] }
 0x6dd   :  { %4137 = vmatprep.subr.bf16.mxu0 %v2738_v11  ;;  %v2783_v11 = vld [vmem:[#allocation3 + $0x1d0] sm:$0xff] }
 0x6e0   :  { %4139 = vmatpush1.bf16.msra.mxu0 %v2737_v9  ;;  %v2786_v9 = vld [vmem:[#allocation3 + $0x1e8] sm:$0xff] }
 0x6e1   :  { %4141 = vmatprep.subr.bf16.mxu0 %v2740_v13  ;;  %v2785_v13 = vld [vmem:[#allocation3 + $0x1e0] sm:$0xff] }
 0x6e4   :  { %4143 = vmatpush1.bf16.msra.mxu0 %v2739_v14  ;;  %v2788_v14 = vld [vmem:[#allocation3 + $0x1f8] sm:$0xff] }
 0x6e5   :  { %4145 = vmatprep.subr.bf16.mxu0 %v2742_v10  ;;  %v2787_v10 = vld [vmem:[#allocation3 + $0x1f0] sm:$0xff] }
 0x6e8   :  { %4147 = vmatpush1.bf16.msra.mxu0 %v2741_v37  ;;  %v2790_v37 = vld [vmem:[#allocation3 + $0x208] sm:$0xff] }
 0x6e9   :  { %4149 = vmatprep.subr.bf16.mxu0 %v2744_v45  ;;  %v2789_v45 = vld [vmem:[#allocation3 + $0x200] sm:$0xff] }
 0x6ec   :  { %4151 = vmatpush1.bf16.msra.mxu0 %v2743_v22  ;;  %v2792_v22 = vld [vmem:[#allocation3 + $0x218] sm:$0xff] }
 0x6ed   :  { %4153 = vmatprep.subr.bf16.mxu0 %v2746_v23  ;;  %v2791_v23 = vld [vmem:[#allocation3 + $0x210] sm:$0xff] }
 0x6f0   :  { %4155 = vmatpush1.bf16.msra.mxu0 %v2745_v24  ;;  %v2794_v24 = vld [vmem:[#allocation3 + $0x228] sm:$0xff] }
 0x6f1   :  { %4157 = vmatprep.subr.bf16.mxu0 %v2748_v25  ;;  %v2793_v25 = vld [vmem:[#allocation3 + $0x220] sm:$0xff] }
 0x6f4   :  { %4159 = vmatpush1.bf16.msra.mxu0 %v2747_v26  ;;  %v2796_v26 = vld [vmem:[#allocation3 + $0x238] sm:$0xff] }
 0x6f5   :  { %4161 = vmatprep.subr.bf16.mxu0 %v2750_v27  ;;  %v2795_v27 = vld [vmem:[#allocation3 + $0x230] sm:$0xff] }
 0x6f8   :  { %4163 = vmatpush1.bf16.msra.mxu0 %v2749_v35  ;;  %v2798_v35 = vld [vmem:[#allocation3 + $0x248] sm:$0xff] }
 0x6f9   :  { %4165 = vmatprep.subr.bf16.mxu0 %v2752_v28  ;;  %v2803_v28 = vld [vmem:[#allocation3 + $0x270] sm:$0xff] }
 0x6fc   :  { %4167 = vmatpush1.bf16.msra.mxu0 %v2751_v29  ;;  %v2806_v29 = vld [vmem:[#allocation3 + $0x288] sm:$0xff] }
 0x6fd   :  { %4169 = vmatprep.subr.bf16.mxu0 %v2754_v30  ;;  %v2805_v30 = vld [vmem:[#allocation3 + $0x280] sm:$0xff] }
 0x700   :  { %4171 = vmatpush1.bf16.msra.mxu0 %v2753_v31  ;;  %v2808_v31 = vld [vmem:[#allocation3 + $0x298] sm:$0xff] }
 0x701   :  { %4173 = vmatprep.subr.bf16.mxu0 %v2756_v39  ;;  %v2807_v39 = vld [vmem:[#allocation3 + $0x290] sm:$0xff] }
 0x704   :  { %4175 = vmatpush1.bf16.msra.mxu0 %v2755_v40  ;;  %v2810_v40 = vld [vmem:[#allocation3 + $0x2a8] sm:$0xff] }
 0x705   :  { %4177 = vmatprep.subr.bf16.mxu0 %v2758_v33  ;;  %v2809_v33 = vld [vmem:[#allocation3 + $0x2a0] sm:$0xff] }
 0x707   :  { %3186 = vmatmul.mubr.f32.vlgmr.msra.gmra.mrb[8].mxu0 %v2713_v51  ;;  %v2767_v51 = vld [vmem:[#allocation3 + $0x150] sm:$0xff] }
 0x708   :  { %4179 = vmatpush1.bf16.msra.mxu0 %v2757_v34  ;;  %3256 = vmatprep.mubr.f32.mxu0 %v2716_v56  ;;  %v2772_v56 = vld [vmem:[#allocation3 + $0x178] sm:$0xff] }
 0x709   :  { %4181 = vmatprep.subr.bf16.mxu0 %v2760_v15  ;;  %v2812_v34 = vld [vmem:[#allocation3 + $0x2b8] sm:$0xff]  ;;  %v2811_v15 = vld [vmem:[#allocation3 + $0x2b0] sm:$0xff] }
 0x70c   :  { %4183 = vmatpush1.bf16.msra.mxu0 %v2759_v36  ;;  %v2814_v36 = vld [vmem:[#allocation3 + $0x2c8] sm:$0xff] }
 0x70d   :  { %4185 = vmatprep.subr.bf16.mxu0 %v2762_v18  ;;  %v2813_v18 = vld [vmem:[#allocation3 + $0x2c0] sm:$0xff] }
 0x710   :  { %4187 = vmatpush1.bf16.msra.mxu0 %v2761_v54  ;;  %v2816_v54 = vld [vmem:[#allocation3 + $0x2d8] sm:$0xff] }
 0x711   :  { %4189 = vmatprep.subr.bf16.mxu0 %v2764_v55  ;;  %v2815_v55 = vld [vmem:[#allocation3 + $0x2d0] sm:$0xff] }
 0x714   :  { %4191 = vmatpush1.bf16.msra.mxu0 %v2763_v21  ;;  %v2818_v21 = vld [vmem:[#allocation3 + $0x2e8] sm:$0xff] }
 0x715   :  { %4193 = vmatprep.subr.bf16.mxu0 %v2766_v52  ;;  %v2817_v52 = vld [vmem:[#allocation3 + $0x2e0] sm:$0xff] }
 0x718   :  { %4195 = vmatpush1.bf16.msra.mxu0 %v2765_v38  ;;  %v2820_v38 = vld [vmem:[#allocation3 + $0x2f8] sm:$0xff] }
 0x719   :  { %4197 = vmatprep.subr.bf16.mxu0 %v2768_v19  ;;  %v2819_v19 = vld [vmem:[#allocation3 + $0x2f0] sm:$0xff] }
 0x71c   :  { %4199 = vmatpush1.bf16.msra.mxu0 %v2767_v51  ;;  %v2822_v51 = vld [vmem:[#allocation3 + $0x308] sm:$0xff] }
 0x71d   :  { %4201 = vmatprep.subr.bf16.mxu0 %v2770_v44  ;;  %v2821_v44 = vld [vmem:[#allocation3 + $0x300] sm:$0xff] }
 0x720   :  { %4203 = vmatpush1.bf16.msra.mxu0 %v2769_v32  ;;  %v2824_v32 = vld [vmem:[#allocation3 + $0x318] sm:$0xff] }
 0x721   :  { %4205 = vmatprep.subr.bf16.mxu0 %v2772_v56  ;;  %v2823_v56 = vld [vmem:[#allocation3 + $0x310] sm:$0xff] }
 0x724   :  { %4207 = vmatpush1.bf16.msra.mxu0 %v2771_v60  ;;  %v2826_v60 = vld [vmem:[#allocation3 + $0x328] sm:$0xff] }
 0x725   :  { %4209 = vmatprep.subr.bf16.mxu0 %v2774_v61  ;;  %v2825_v61 = vld [vmem:[#allocation3 + $0x320] sm:$0xff] }
 0x728   :  { %4211 = vmatpush1.bf16.msra.mxu0 %v2773_v62  ;;  %v2828_v62 = vld [vmem:[#allocation3 + $0x338] sm:$0xff] }
 0x729   :  { %4213 = vmatprep.subr.bf16.mxu0 %v2776_v63  ;;  %v2827_v63 = vld [vmem:[#allocation3 + $0x330] sm:$0xff] }
 0x72c   :  { %4215 = vmatpush1.bf16.msra.mxu0 %v2775_v0  ;;  %v2830_v0 = vld [vmem:[#allocation3 + $0x348] sm:$0xff] }
 0x72d   :  { %4217 = vmatprep.subr.bf16.mxu0 %v2778_v1  ;;  %v2835_v1 = vld [vmem:[#allocation3 + $0x370] sm:$0xff] }
 0x730   :  { %4219 = vmatpush1.bf16.msra.mxu0 %v2777_v2  ;;  %v2838_v2 = vld [vmem:[#allocation3 + $0x388] sm:$0xff] }
 0x731   :  { %4221 = vmatprep.subr.bf16.mxu0 %v2780_v16  ;;  %v2837_v16 = vld [vmem:[#allocation3 + $0x380] sm:$0xff] }
 0x734   :  { %4223 = vmatpush1.bf16.msra.mxu0 %v2779_v3  ;;  %v2840_v3 = vld [vmem:[#allocation3 + $0x398] sm:$0xff] }
 0x735   :  { %4225 = vmatprep.subr.bf16.mxu0 %v2782_v4  ;;  %v2839_v4 = vld [vmem:[#allocation3 + $0x390] sm:$0xff] }
 0x738   :  { %4227 = vmatpush1.bf16.msra.mxu0 %v2781_v7  ;;  %v2842_v7 = vld [vmem:[#allocation3 + $0x3a8] sm:$0xff] }
 0x739   :  { %4229 = vmatprep.subr.bf16.mxu0 %v2784_v8  ;;  %v2841_v8 = vld [vmem:[#allocation3 + $0x3a0] sm:$0xff] }
 0x73c   :  { %4231 = vmatpush1.bf16.msra.mxu0 %v2783_v11  ;;  %v2844_v11 = vld [vmem:[#allocation3 + $0x3b8] sm:$0xff] }
 0x73d   :  { %4233 = vmatprep.subr.bf16.mxu0 %v2786_v9  ;;  %v2843_v9 = vld [vmem:[#allocation3 + $0x3b0] sm:$0xff] }
 0x740   :  { %4235 = vmatpush1.bf16.msra.mxu0 %v2785_v13  ;;  %v2846_v13 = vld [vmem:[#allocation3 + $0x3c8] sm:$0xff] }
 0x741   :  { %4237 = vmatprep.subr.bf16.mxu0 %v2788_v14  ;;  %v2845_v14 = vld [vmem:[#allocation3 + $0x3c0] sm:$0xff] }
 0x744   :  { %4239 = vmatpush1.bf16.msra.mxu0 %v2787_v10  ;;  %v2848_v10 = vld [vmem:[#allocation3 + $0x3d8] sm:$0xff] }
 0x745   :  { %4241 = vmatprep.subr.bf16.mxu0 %v2790_v37  ;;  %v2847_v37 = vld [vmem:[#allocation3 + $0x3d0] sm:$0xff] }
 0x747   :  { %3257 = vmatmul.mubr.f32.vlgmr.msra.gmra.mrb[8].mxu0 %v2715_v53  ;;  %v2799_v53 = vld [vmem:[#allocation3 + $0x250] sm:$0xff] }
 0x748   :  { %4243 = vmatpush1.bf16.msra.mxu0 %v2789_v45  ;;  %3327 = vmatprep.mubr.f32.mxu0 %v2718_v58  ;;  %v2804_v58 = vld [vmem:[#allocation3 + $0x278] sm:$0xff]  ;;  %v2850_v45 = vld [vmem:[#allocation3 + $0x3e8] sm:$0xff] }
 0x749   :  { %4245 = vmatprep.subr.bf16.mxu0 %v2792_v22  ;;  %v2849_v22 = vld [vmem:[#allocation3 + $0x3e0] sm:$0xff] }
 0x74c   :  { %4247 = vmatpush1.bf16.msra.mxu0 %v2791_v23  ;;  %v2852_v23 = vld [vmem:[#allocation3 + $0x3f8] sm:$0xff] }
 0x74d   :  { %4249 = vmatprep.subr.bf16.mxu0 %v2794_v24  ;;  %v2851_v24 = vld [vmem:[#allocation3 + $0x3f0] sm:$0xff] }
 0x750   :  { %4251 = vmatpush1.bf16.msra.mxu0 %v2793_v25  ;;  %v3109_v25 = vld [vmem:[#allocation16] sm:$0x3] }
 0x751   :  { %4253 = vmatprep.subr.bf16.mxu0 %v2796_v26  ;;  %v3114_v26 = vrot.slane %v3109_v25, %v5097_v42 }
 0x754   :  { %4255 = vmatpush1.bf16.msra.mxu0 %v2795_v27  ;;  %v3118_v27 = vrot.slane %v3109_v25, %v5101_v12 }
 0x755   :  { %4257 = vmatprep.subr.bf16.mxu0 %v2798_v35 }
 0x758   :  { %4259 = vmatpush1.bf16.msra.mxu0 %v2797_v43 }
 0x759   :  { %4261 = vmatprep.subr.bf16.mxu0 %v2800_v41 }
 0x75c   :  { %4263 = vmatpush1.bf16.msra.mxu0 %v2799_v53 }
 0x75d   :  { %4265 = vmatprep.subr.bf16.mxu0 %v2802_v6 }
 0x760   :  { %4267 = vmatpush1.bf16.msra.mxu0 %v2801_v48 }
 0x761   :  { %4269 = vmatprep.subr.bf16.mxu0 %v2804_v58 }
 0x764   :  { %4271 = vmatpush1.bf16.msra.mxu0 %v2803_v28 }
 0x765   :  { %4273 = vmatprep.subr.bf16.mxu0 %v2806_v29 }
 0x768   :  { %4275 = vmatpush1.bf16.msra.mxu0 %v2805_v30 }
 0x769   :  { %4277 = vmatprep.subr.bf16.mxu0 %v2808_v31 }
 0x76c   :  { %4279 = vmatpush1.bf16.msra.mxu0 %v2807_v39 }
 0x76d   :  { %4281 = vmatprep.subr.bf16.mxu0 %v2810_v40 }
 0x770   :  { %4283 = vmatpush1.bf16.msra.mxu0 %v2809_v33 }
 0x771   :  { %4285 = vmatprep.subr.bf16.mxu0 %v2812_v34 }
 0x774   :  { %4287 = vmatpush1.bf16.msra.mxu0 %v2811_v15 }
 0x775   :  { %4289 = vmatprep.subr.bf16.mxu0 %v2814_v36 }
 0x778   :  { %4291 = vmatpush1.bf16.msra.mxu0 %v2813_v18 }
 0x779   :  { %4293 = vmatprep.subr.bf16.mxu0 %v2816_v54 }
 0x77c   :  { %4295 = vmatpush1.bf16.msra.mxu0 %v2815_v55 }
 0x77d   :  { %4297 = vmatprep.subr.bf16.mxu0 %v2818_v21 }
 0x780   :  { %4299 = vmatpush1.bf16.msra.mxu0 %v2817_v52 }
 0x781   :  { %4301 = vmatprep.subr.bf16.mxu0 %v2820_v38 }
 0x784   :  { %4303 = vmatpush1.bf16.msra.mxu0 %v2819_v19 }
 0x785   :  { %4305 = vmatprep.subr.bf16.mxu0 %v2822_v51 }
 0x787   :  { %3328 = vmatmul.mubr.f32.vlgmr.msra.gmra.mrb[8].mxu0 %v2717_v57  ;;  %v2831_v57 = vld [vmem:[#allocation3 + $0x350] sm:$0xff] }
 0x788   :  { %4307 = vmatpush1.bf16.msra.mxu0 %v2821_v44  ;;  %3398 = vmatprep.mubr.f32.mxu0 %v2720_v59  ;;  %v2836_v59 = vld [vmem:[#allocation3 + $0x378] sm:$0xff] }
 0x789   :  { %4309 = vmatprep.subr.bf16.mxu0 %v2824_v32 }
 0x78c   :  { %4311 = vmatpush1.bf16.msra.mxu0 %v2823_v56 }
 0x78d   :  { %4313 = vmatprep.subr.bf16.mxu0 %v2826_v60 }
 0x790   :  { %4315 = vmatpush1.bf16.msra.mxu0 %v2825_v61 }
 0x791   :  { %4317 = vmatprep.subr.bf16.mxu0 %v2828_v62 }
 0x794   :  { %4319 = vmatpush1.bf16.msra.mxu0 %v2827_v63 }
 0x795   :  { %4321 = vmatprep.subr.bf16.mxu0 %v2830_v0 }
 0x798   :  { %4323 = vmatpush1.bf16.msra.mxu0 %v2829_v5 }
 0x799   :  { %4325 = vmatprep.subr.bf16.mxu0 %v2832_v47 }
 0x79c   :  { %4327 = vmatpush1.bf16.msra.mxu0 %v2831_v57 }
 0x79d   :  { %4329 = vmatprep.subr.bf16.mxu0 %v2834_v20 }
 0x7a0   :  { %4331 = vmatpush1.bf16.msra.mxu0 %v2833_v50 }
 0x7a1   :  { %4333 = vmatprep.subr.bf16.mxu0 %v2836_v59 }
 0x7a4   :  { %4335 = vmatpush1.bf16.msra.mxu0 %v2835_v1 }
 0x7a5   :  { %4337 = vmatprep.subr.bf16.mxu0 %v2838_v2 }
 0x7a8   :  { %4339 = vmatpush1.bf16.msra.mxu0 %v2837_v16 }
 0x7a9   :  { %4341 = vmatprep.subr.bf16.mxu0 %v2840_v3 }
 0x7ac   :  { %4343 = vmatpush1.bf16.msra.mxu0 %v2839_v4 }
 0x7ad   :  { %4345 = vmatprep.subr.bf16.mxu0 %v2842_v7 }
 0x7b0   :  { %4347 = vmatpush1.bf16.msra.mxu0 %v2841_v8 }
 0x7b1   :  { %4349 = vmatprep.subr.bf16.mxu0 %v2844_v11 }
 0x7b4   :  { %4351 = vmatpush1.bf16.msra.mxu0 %v2843_v9 }
 0x7b5   :  { %4353 = vmatprep.subr.bf16.mxu0 %v2846_v13 }
 0x7b8   :  { %4355 = vmatpush1.bf16.msra.mxu0 %v2845_v14 }
 0x7b9   :  { %4357 = vmatprep.subr.bf16.mxu0 %v2848_v10 }
 0x7bc   :  { %4359 = vmatpush1.bf16.msra.mxu0 %v2847_v37 }
 0x7bd   :  { %4361 = vmatprep.subr.bf16.mxu0 %v2850_v45 }
 0x7c0   :  { %4363 = vmatpush1.bf16.msra.mxu0 %v2849_v22 }
 0x7c1   :  { %4365 = vmatprep.subr.bf16.mxu0 %v2852_v23 }
 0x7c4   :  { %4367 = vmatpush1.bf16.msra.mxu0 %v2851_v24 }
 0x7c7   :  { %3399 = vmatmul.mubr.f32.vlgmr.msra.gmra.mrb[8].mxu0 %v2719_v17 }
 0x89a   :  { %v3400_v35 = vpop.f32.mrb[8].mxu0 }
 0x89b   :  { %v4372_v43 = vadd.f32 %v3400_v35, %v3114_v26  ;;  %v3402_v41 = vpop.f32.mrb[9].mxu0 }
 0x89c   :  { %v4373_v53 = vadd.f32 %v3402_v41, %v3118_v27 }
 0x89d   :  { %4624 = vtanh.f32 %v4372_v43 }
 0x89e   :  { %4626 = vtanh.f32 %v4373_v53 }
 0x8a7   :  { %v4625_v6 = vpop.eup %4624 }
 0x8a8   :  { %v4627_v48 = vpop.eup %4626  ;;  %3407 = vst [vmem:[%s5315_s15] sm:$0xff] %v4625_v6 }
 0x8a9   :  { %3408 = vst [vmem:[%s5315_s15 + $0x8] sm:$0xff] %v4627_v48 }
 0x8aa   :  { %3413 = vsyncpa [#allocation6], 1 }
 0x8ab   :  { %3414 = vsyncpa [#allocation8], 1 }
 0x8ac   :  { %3415 = vsyncpa [#allocation11], 1 }
 0x8ad   :  { %3416 = vsyncpa [#allocation14], 1 }
 0x8ae   :  { %3417 = vsyncpa [#allocation17], 1 }
 0x8af   :  { %3418 = vsyncmov [#allocation4] }
 0x8b2   :  { %s3419_s18 = vpop.sfrf %3418 }
 0x8b3   :  { %p3440_p8 = scmp.ne.s32.totalorder %s3419_s18, 0 }
 0x8b5   :  { %3423 = shalt.err (%p3440_p8)  }
 0x8b6   :  { %3425 = vsyncmov [#allocation4 + $0x1] }
 0x8b9   :  { %s3426_s22 = vpop.sfrf %3425 }
 0x8ba   :  { %p3441_p9 = scmp.ne.s32.totalorder %s3426_s22, 0 }
 0x8bc   :  { %3430 = shalt.err (%p3441_p9)  }

</bundles_post_ra>
